<compile_context>
chip_gen: v7x
topology: tpu7x:2x2x1
jax: 0.10.0
libtpu: 0.0.40
codegen_flags: <defaults>
</compile_context>

<pallas_src>
import math
import functools

import jax
import jax.numpy as jnp
from jax import lax
from jax.experimental import pallas as pl
from jax.experimental.pallas import tpu as pltpu


def _attention_kernel(x_ref, wqkv_ref, bqkv_ref, wo_ref, bo_ref, o_ref,
                      merged_ref, *, heads: int, scale: float):
    # x_ref:      (1, N, D)  bf16   current batch element
    # wqkv_ref:   (D, 3D)    bf16   fused "x @ w" QKV weight (q|k|v blocks)
    # bqkv_ref:   (1, 3D)    f32    fused QKV bias
    # wo_ref:     (D, D)     bf16   nn1 "x @ w" weight
    # bo_ref:     (1, D)     f32    nn1 bias
    # merged_ref: (N, D)     bf16   VMEM scratch: heads merged '(h d)' layout
    _, n, d_model = x_ref.shape
    dh = d_model // heads

    x = x_ref[0]                                              # (N, D) bf16

    # Fused QKV projection: one lane-dense matmul, f32 accumulation.
    qkv = jnp.dot(x, wqkv_ref[...],
                  preferred_element_type=jnp.float32) + bqkv_ref[...]  # (N,3D)

    # Apply the softmax scale to q (N*D mults) rather than to the (N,N) scores.
    # Module semantics: scale = dim ** -0.5 (full model dim, not head dim).
    q = (qkv[:, 0:d_model] * scale).astype(jnp.bfloat16)
    k = qkv[:, d_model:2 * d_model].astype(jnp.bfloat16)
    v = qkv[:, 2 * d_model:3 * d_model].astype(jnp.bfloat16)

    # Per-head scores / softmax / weighted sum.  Unrolled at trace time: the
    # per-head intermediates here are only (N,dh)=(16,16) and (N,N)=(16,16),
    # so live ranges are tiny.  (At ViT-scale N, tile N via a grid axis.)
    for h in range(heads):
        sl = slice(h * dh, (h + 1) * dh)
        q_h, k_h, v_h = q[:, sl], k[:, sl], v[:, sl]
        # dots = q_h @ k_h^T : contract head dim of both sides, no transpose op.
        dots = lax.dot_general(q_h, k_h, (((1,), (1,)), ((), ())),
                               preferred_element_type=jnp.float32)   # (N,N) f32
        dots = dots - jnp.max(dots, axis=-1, keepdims=True)          # stable
        e = jnp.exp(dots)
        attn = e * pl.reciprocal(jnp.sum(e, axis=-1, keepdims=True),
                                 approx=True)
        o_h = jnp.dot(attn.astype(jnp.bfloat16), v_h,
                      preferred_element_type=jnp.float32)            # (N, dh)
        # 'b h n d -> b n (h d)' merge: head h lands at lane offset h*dh.
        merged_ref[:, sl] = o_h.astype(jnp.bfloat16)

    # Fused output projection nn1: one (N,D) x (D,D) matmul, K = D.
    out = jnp.dot(merged_ref[...], wo_ref[...],
                  preferred_element_type=jnp.float32) + bo_ref[...]
    # TODO(synk): mask path (F.pad + masked_fill) not implemented (mask=None).
    # TODO(synk): training-mode dropout (do1) omitted; eval-mode forward only.
    o_ref[0] = out.astype(o_ref.dtype)


def attention_forward(x, w_qkv, b_qkv, w_o, b_o, *, heads: int = 8):
    """Attention.forward(x, mask=None), eval mode.

    x:      (B, N, D)
    w_qkv:  (3D, D)  torch nn.Linear weight (y = x @ W.T + b), channels (qkv,h,d)
    b_qkv:  (3D,)
    w_o:    (D, D)   nn1 weight, input channels ordered (h, d)
    b_o:    (D,)
    """
    B, N, D = x.shape
    assert D % heads == 0, "dim must be divisible by heads"
    scale = float(D) ** -0.5

    # Lane-dense "x @ w" layouts (no 16-wide, lane-padded per-head tiles).
    # bf16 MXU operands, f32 biases (added post-accumulation in f32).
    wqkv = jnp.asarray(w_qkv).T.astype(jnp.bfloat16)            # (D, 3D)
    bqkv = jnp.asarray(b_qkv).reshape(1, 3 * D).astype(jnp.float32)
    wo = jnp.asarray(w_o).T.astype(jnp.bfloat16)                # (D, D)
    bo = jnp.asarray(b_o).reshape(1, D).astype(jnp.float32)
    x_bf = x.astype(jnp.bfloat16)

    kernel = functools.partial(_attention_kernel, heads=heads, scale=scale)

    batch_spec = pl.BlockSpec((1, N, D), lambda b: (b, 0, 0))

    return pl.pallas_call(
        kernel,
        out_shape=jax.ShapeDtypeStruct((B, N, D), x.dtype),
        grid=(B,),
        in_specs=[batch_spec,
                  pl.BlockSpec((D, 3 * D), lambda b: (0, 0)),   # wqkv (resident)
                  pl.BlockSpec((1, 3 * D), lambda b: (0, 0)),   # bqkv
                  pl.BlockSpec((D, D), lambda b: (0, 0)),       # wo
                  pl.BlockSpec((1, D), lambda b: (0, 0))],      # bo
        out_specs=batch_spec,
        scratch_shapes=[pltpu.VMEM((N, D), jnp.bfloat16)],      # merged heads
        compiler_params=pltpu.CompilerParams(
            dimension_semantics=("parallel",),       # shard batch over 2 TCs
            vmem_limit_bytes=32 * 1024 * 1024),      # safe on v5e/v6e/v7x
    )(x_bf, wqkv, bqkv, wo, bo)


def attention_ref(x, w_qkv, b_qkv, w_o, b_o, *, heads):
    """Pure-JAX f32 reference for the eval-mode forward (mask=None)."""
    B, N, D = x.shape
    d = D // heads
    scale = float(D) ** -0.5
    qkv = x @ w_qkv.T + b_qkv                            # (B, N, 3D)
    qkv = qkv.reshape(B, N, 3, heads, d)                 # 'b n (qkv h d)'
    q = jnp.transpose(qkv[:, :, 0], (0, 2, 1, 3))        # (B, H, N, d)
    k = jnp.transpose(qkv[:, :, 1], (0, 2, 1, 3))
    v = jnp.transpose(qkv[:, :, 2], (0, 2, 1, 3))
    dots = jnp.einsum('bhid,bhjd->bhij', q, k) * scale
    attn = jax.nn.softmax(dots, axis=-1)
    out = jnp.einsum('bhij,bhjd->bhid', attn, v)
    out = jnp.transpose(out, (0, 2, 1, 3)).reshape(B, N, D)
    return out @ w_o.T + b_o


if __name__ == "__main__":
    B, N, D, H = 2, 16, 128, 8        # batch=2, seq=16, dim=128, heads=8 (d=16)

    key = jax.random.PRNGKey(0)
    kx, kqkv, ko, kb1, kb2 = jax.random.split(key, 5)

    x = jax.random.normal(kx, (B, N, D), dtype=jnp.float32)

    # xavier_uniform-style weights, like the torch __init__.
    lim_qkv = math.sqrt(6.0 / (D + 3 * D))
    w_qkv = jax.random.uniform(kqkv, (3 * D, D), jnp.float32, -lim_qkv, lim_qkv)
    lim_o = math.sqrt(6.0 / (D + D))
    w_o = jax.random.uniform(ko, (D, D), jnp.float32, -lim_o, lim_o)
    # torch init zeros the biases; use small random biases so the kernel's
    # bias-add path is actually exercised.
    b_qkv = 0.02 * jax.random.normal(kb1, (3 * D,), jnp.float32)
    b_o = 0.02 * jax.random.normal(kb2, (D,), jnp.float32)

    out = attention_forward(x, w_qkv, b_qkv, w_o, b_o, heads=H)
    out = jax.block_until_ready(out)

    ref = attention_ref(x, w_qkv, b_qkv, w_o, b_o, heads=H)
    assert out.shape == (B, N, D)
    max_err = float(jnp.max(jnp.abs(out - ref)))
    # bf16 MXU inputs with f32 accumulation / f32 softmax: expect ~1e-3-1e-2.
    assert jnp.allclose(out, ref, atol=2e-2, rtol=2e-2), f"max abs err {max_err}"

    print("KERNEL_OK")
</pallas_src>

<mosaic_0001>
module attributes {stable_mosaic.version = 11 : i64} {
  func.func @_attention_kernel(%arg0: i32, %arg1: memref<1x16x128xbf16, #tpu.memory_space<vmem>>, %arg2: memref<128x384xbf16, #tpu.memory_space<vmem>>, %arg3: memref<1x384xf32, #tpu.memory_space<vmem>>, %arg4: memref<128x128xbf16, #tpu.memory_space<vmem>>, %arg5: memref<1x128xf32, #tpu.memory_space<vmem>>, %arg6: memref<1x16x128xf32, #tpu.memory_space<vmem>>, %arg7: memref<16x128xbf16, #tpu.memory_space<vmem>>) attributes {dimension_semantics = [#tpu.dimension_semantics<parallel>], iteration_bounds = array<i64: 2>, scalar_prefetch = 0 : i64, scratch_operands = 1 : i64, tpu.core_type = #tpu.core_type<tc>, window_params = [{transform_indices = @transform_0, window_bounds = array<i64: 1, 16, 128>}, {pipeline_mode = #tpu.pipeline_mode<synchronous>, transform_indices = @transform_1, window_bounds = array<i64: 128, 384>}, {pipeline_mode = #tpu.pipeline_mode<synchronous>, transform_indices = @transform_2, window_bounds = array<i64: 1, 384>}, {pipeline_mode = #tpu.pipeline_mode<synchronous>, transform_indices = @transform_3, window_bounds = array<i64: 128, 128>}, {pipeline_mode = #tpu.pipeline_mode<synchronous>, transform_indices = @transform_4, window_bounds = array<i64: 1, 128>}, {transform_indices = @transform_5, window_bounds = array<i64: 1, 16, 128>}]} {
    %c0 = arith.constant 0 : index
    %c0_0 = arith.constant 0 : index
    %c0_1 = arith.constant 0 : index
    %0 = vector.load %arg1[%c0, %c0_0, %c0_1] : memref<1x16x128xbf16, #tpu.memory_space<vmem>>, vector<1x16x128xbf16>
    %1 = vector.shape_cast %0 : vector<1x16x128xbf16> to vector<16x128xbf16>
    %c0_2 = arith.constant 0 : index
    %c0_3 = arith.constant 0 : index
    %2 = vector.load %arg2[%c0_2, %c0_3] : memref<128x384xbf16, #tpu.memory_space<vmem>>, vector<128x384xbf16>
    %cst = arith.constant dense<0.000000e+00> : vector<16x384xf32>
    %3 = tpu.matmul %1, %2, %cst {dimension_numbers = #tpu.dot_dimension_numbers<[1], [0], [0], [1], [0, 0, 1, 1], [], []>} : vector<16x128xbf16>, vector<128x384xbf16>, vector<16x384xf32> -> vector<16x384xf32>
    %c0_4 = arith.constant 0 : index
    %c0_5 = arith.constant 0 : index
    %4 = vector.load %arg3[%c0_4, %c0_5] : memref<1x384xf32, #tpu.memory_space<vmem>>, vector<1x384xf32>
    %5 = vector.broadcast %4 : vector<1x384xf32> to vector<16x384xf32>
    %6 = arith.addf %3, %5 : vector<16x384xf32>
    %7 = vector.extract_strided_slice %6 {offsets = [0, 0], sizes = [16, 128], strides = [1, 1]} : vector<16x384xf32> to vector<16x128xf32>
    %cst_6 = arith.constant 0.0883883461 : f32
    %8 = vector.broadcast %cst_6 : f32 to vector<16x128xf32>
    %9 = arith.mulf %7, %8 : vector<16x128xf32>
    %10 = arith.truncf %9 : vector<16x128xf32> to vector<16x128xbf16>
    %11 = vector.extract_strided_slice %6 {offsets = [0, 128], sizes = [16, 128], strides = [1, 1]} : vector<16x384xf32> to vector<16x128xf32>
    %12 = arith.truncf %11 : vector<16x128xf32> to vector<16x128xbf16>
    %13 = vector.extract_strided_slice %6 {offsets = [0, 256], sizes = [16, 128], strides = [1, 1]} : vector<16x384xf32> to vector<16x128xf32>
    %14 = arith.truncf %13 : vector<16x128xf32> to vector<16x128xbf16>
    %15 = vector.extract_strided_slice %10 {offsets = [0, 0], sizes = [16, 16], strides = [1, 1]} : vector<16x128xbf16> to vector<16x16xbf16>
    %16 = vector.extract_strided_slice %12 {offsets = [0, 0], sizes = [16, 16], strides = [1, 1]} : vector<16x128xbf16> to vector<16x16xbf16>
    %17 = vector.extract_strided_slice %14 {offsets = [0, 0], sizes = [16, 16], strides = [1, 1]} : vector<16x128xbf16> to vector<16x16xbf16>
    %cst_7 = arith.constant dense<0.000000e+00> : vector<16x16xf32>
    %18 = tpu.matmul %15, %16, %cst_7 {dimension_numbers = #tpu.dot_dimension_numbers<[1], [1], [0], [0], [0, 0, 1, 0], [], []>} : vector<16x16xbf16>, vector<16x16xbf16>, vector<16x16xf32> -> vector<16x16xf32>
    %cst_8 = arith.constant dense<0xFF800000> : vector<16xf32>
    %19 = vector.multi_reduction <maximumf>, %18, %cst_8 [1] : vector<16x16xf32> to vector<16xf32>
    %20 = vector.shape_cast %19 : vector<16xf32> to vector<16x1xf32>
    %21 = vector.broadcast %20 : vector<16x1xf32> to vector<16x16xf32>
    %22 = arith.subf %18, %21 : vector<16x16xf32>
    %23 = math.exp %22 : vector<16x16xf32>
    %cst_9 = arith.constant dense<0.000000e+00> : vector<16xf32>
    %24 = vector.multi_reduction <add>, %23, %cst_9 [1] : vector<16x16xf32> to vector<16xf32>
    %25 = vector.shape_cast %24 : vector<16xf32> to vector<16x1xf32>
    %26 = tpu.reciprocal %25 {approx = true} : vector<16x1xf32> -> vector<16x1xf32>
    %27 = vector.broadcast %26 : vector<16x1xf32> to vector<16x16xf32>
    %28 = arith.mulf %23, %27 : vector<16x16xf32>
    %29 = arith.truncf %28 : vector<16x16xf32> to vector<16x16xbf16>
    %cst_10 = arith.constant dense<0.000000e+00> : vector<16x16xf32>
    %30 = tpu.matmul %29, %17, %cst_10 {dimension_numbers = #tpu.dot_dimension_numbers<[1], [0], [0], [1], [0, 0, 1, 1], [], []>} : vector<16x16xbf16>, vector<16x16xbf16>, vector<16x16xf32> -> vector<16x16xf32>
    %31 = arith.truncf %30 : vector<16x16xf32> to vector<16x16xbf16>
    %c0_11 = arith.constant 0 : index
    %c0_12 = arith.constant 0 : index
    %32 = vector.load %arg7[%c0_11, %c0_12] : memref<16x128xbf16, #tpu.memory_space<vmem>>, vector<16x16xbf16>
    tpu.vector_store %arg7[%c0_11, %c0_12], %31 {strides = array<i32>} : memref<16x128xbf16, #tpu.memory_space<vmem>>, vector<16x16xbf16>,
    %33 = vector.extract_strided_slice %10 {offsets = [0, 16], sizes = [16, 16], strides = [1, 1]} : vector<16x128xbf16> to vector<16x16xbf16>
    %34 = vector.extract_strided_slice %12 {offsets = [0, 16], sizes = [16, 16], strides = [1, 1]} : vector<16x128xbf16> to vector<16x16xbf16>
    %35 = vector.extract_strided_slice %14 {offsets = [0, 16], sizes = [16, 16], strides = [1, 1]} : vector<16x128xbf16> to vector<16x16xbf16>
    %cst_13 = arith.constant dense<0.000000e+00> : vector<16x16xf32>
    %36 = tpu.matmul %33, %34, %cst_13 {dimension_numbers = #tpu.dot_dimension_numbers<[1], [1], [0], [0], [0, 0, 1, 0], [], []>} : vector<16x16xbf16>, vector<16x16xbf16>, vector<16x16xf32> -> vector<16x16xf32>
    %cst_14 = arith.constant dense<0xFF800000> : vector<16xf32>
    %37 = vector.multi_reduction <maximumf>, %36, %cst_14 [1] : vector<16x16xf32> to vector<16xf32>
    %38 = vector.shape_cast %37 : vector<16xf32> to vector<16x1xf32>
    %39 = vector.broadcast %38 : vector<16x1xf32> to vector<16x16xf32>
    %40 = arith.subf %36, %39 : vector<16x16xf32>
    %41 = math.exp %40 : vector<16x16xf32>
    %cst_15 = arith.constant dense<0.000000e+00> : vector<16xf32>
    %42 = vector.multi_reduction <add>, %41, %cst_15 [1] : vector<16x16xf32> to vector<16xf32>
    %43 = vector.shape_cast %42 : vector<16xf32> to vector<16x1xf32>
    %44 = tpu.reciprocal %43 {approx = true} : vector<16x1xf32> -> vector<16x1xf32>
    %45 = vector.broadcast %44 : vector<16x1xf32> to vector<16x16xf32>
    %46 = arith.mulf %41, %45 : vector<16x16xf32>
    %47 = arith.truncf %46 : vector<16x16xf32> to vector<16x16xbf16>
    %cst_16 = arith.constant dense<0.000000e+00> : vector<16x16xf32>
    %48 = tpu.matmul %47, %35, %cst_16 {dimension_numbers = #tpu.dot_dimension_numbers<[1], [0], [0], [1], [0, 0, 1, 1], [], []>} : vector<16x16xbf16>, vector<16x16xbf16>, vector<16x16xf32> -> vector<16x16xf32>
    %49 = arith.truncf %48 : vector<16x16xf32> to vector<16x16xbf16>
    %c0_17 = arith.constant 0 : index
    %c16 = arith.constant 16 : index
    %50 = vector.load %arg7[%c0_17, %c16] : memref<16x128xbf16, #tpu.memory_space<vmem>>, vector<16x16xbf16>
    tpu.vector_store %arg7[%c0_17, %c16], %49 {strides = array<i32>} : memref<16x128xbf16, #tpu.memory_space<vmem>>, vector<16x16xbf16>,
    %51 = vector.extract_strided_slice %10 {offsets = [0, 32], sizes = [16, 16], strides = [1, 1]} : vector<16x128xbf16> to vector<16x16xbf16>
    %52 = vector.extract_strided_slice %12 {offsets = [0, 32], sizes = [16, 16], strides = [1, 1]} : vector<16x128xbf16> to vector<16x16xbf16>
    %53 = vector.extract_strided_slice %14 {offsets = [0, 32], sizes = [16, 16], strides = [1, 1]} : vector<16x128xbf16> to vector<16x16xbf16>
    %cst_18 = arith.constant dense<0.000000e+00> : vector<16x16xf32>
    %54 = tpu.matmul %51, %52, %cst_18 {dimension_numbers = #tpu.dot_dimension_numbers<[1], [1], [0], [0], [0, 0, 1, 0], [], []>} : vector<16x16xbf16>, vector<16x16xbf16>, vector<16x16xf32> -> vector<16x16xf32>
    %cst_19 = arith.constant dense<0xFF800000> : vector<16xf32>
    %55 = vector.multi_reduction <maximumf>, %54, %cst_19 [1] : vector<16x16xf32> to vector<16xf32>
    %56 = vector.shape_cast %55 : vector<16xf32> to vector<16x1xf32>
    %57 = vector.broadcast %56 : vector<16x1xf32> to vector<16x16xf32>
    %58 = arith.subf %54, %57 : vector<16x16xf32>
    %59 = math.exp %58 : vector<16x16xf32>
    %cst_20 = arith.constant dense<0.000000e+00> : vector<16xf32>
    %60 = vector.multi_reduction <add>, %59, %cst_20 [1] : vector<16x16xf32> to vector<16xf32>
    %61 = vector.shape_cast %60 : vector<16xf32> to vector<16x1xf32>
    %62 = tpu.reciprocal %61 {approx = true} : vector<16x1xf32> -> vector<16x1xf32>
    %63 = vector.broadcast %62 : vector<16x1xf32> to vector<16x16xf32>
    %64 = arith.mulf %59, %63 : vector<16x16xf32>
    %65 = arith.truncf %64 : vector<16x16xf32> to vector<16x16xbf16>
    %cst_21 = arith.constant dense<0.000000e+00> : vector<16x16xf32>
    %66 = tpu.matmul %65, %53, %cst_21 {dimension_numbers = #tpu.dot_dimension_numbers<[1], [0], [0], [1], [0, 0, 1, 1], [], []>} : vector<16x16xbf16>, vector<16x16xbf16>, vector<16x16xf32> -> vector<16x16xf32>
    %67 = arith.truncf %66 : vector<16x16xf32> to vector<16x16xbf16>
    %c0_22 = arith.constant 0 : index
    %c32 = arith.constant 32 : index
    %68 = vector.load %arg7[%c0_22, %c32] : memref<16x128xbf16, #tpu.memory_space<vmem>>, vector<16x16xbf16>
    tpu.vector_store %arg7[%c0_22, %c32], %67 {strides = array<i32>} : memref<16x128xbf16, #tpu.memory_space<vmem>>, vector<16x16xbf16>,
    %69 = vector.extract_strided_slice %10 {offsets = [0, 48], sizes = [16, 16], strides = [1, 1]} : vector<16x128xbf16> to vector<16x16xbf16>
    %70 = vector.extract_strided_slice %12 {offsets = [0, 48], sizes = [16, 16], strides = [1, 1]} : vector<16x128xbf16> to vector<16x16xbf16>
    %71 = vector.extract_strided_slice %14 {offsets = [0, 48], sizes = [16, 16], strides = [1, 1]} : vector<16x128xbf16> to vector<16x16xbf16>
    %cst_23 = arith.constant dense<0.000000e+00> : vector<16x16xf32>
    %72 = tpu.matmul %69, %70, %cst_23 {dimension_numbers = #tpu.dot_dimension_numbers<[1], [1], [0], [0], [0, 0, 1, 0], [], []>} : vector<16x16xbf16>, vector<16x16xbf16>, vector<16x16xf32> -> vector<16x16xf32>
    %cst_24 = arith.constant dense<0xFF800000> : vector<16xf32>
    %73 = vector.multi_reduction <maximumf>, %72, %cst_24 [1] : vector<16x16xf32> to vector<16xf32>
    %74 = vector.shape_cast %73 : vector<16xf32> to vector<16x1xf32>
    %75 = vector.broadcast %74 : vector<16x1xf32> to vector<16x16xf32>
    %76 = arith.subf %72, %75 : vector<16x16xf32>
    %77 = math.exp %76 : vector<16x16xf32>
    %cst_25 = arith.constant dense<0.000000e+00> : vector<16xf32>
    %78 = vector.multi_reduction <add>, %77, %cst_25 [1] : vector<16x16xf32> to vector<16xf32>
    %79 = vector.shape_cast %78 : vector<16xf32> to vector<16x1xf32>
    %80 = tpu.reciprocal %79 {approx = true} : vector<16x1xf32> -> vector<16x1xf32>
    %81 = vector.broadcast %80 : vector<16x1xf32> to vector<16x16xf32>
    %82 = arith.mulf %77, %81 : vector<16x16xf32>
    %83 = arith.truncf %82 : vector<16x16xf32> to vector<16x16xbf16>
    %cst_26 = arith.constant dense<0.000000e+00> : vector<16x16xf32>
    %84 = tpu.matmul %83, %71, %cst_26 {dimension_numbers = #tpu.dot_dimension_numbers<[1], [0], [0], [1], [0, 0, 1, 1], [], []>} : vector<16x16xbf16>, vector<16x16xbf16>, vector<16x16xf32> -> vector<16x16xf32>
    %85 = arith.truncf %84 : vector<16x16xf32> to vector<16x16xbf16>
    %c0_27 = arith.constant 0 : index
    %c48 = arith.constant 48 : index
    %86 = vector.load %arg7[%c0_27, %c48] : memref<16x128xbf16, #tpu.memory_space<vmem>>, vector<16x16xbf16>
    tpu.vector_store %arg7[%c0_27, %c48], %85 {strides = array<i32>} : memref<16x128xbf16, #tpu.memory_space<vmem>>, vector<16x16xbf16>,
    %87 = vector.extract_strided_slice %10 {offsets = [0, 64], sizes = [16, 16], strides = [1, 1]} : vector<16x128xbf16> to vector<16x16xbf16>
    %88 = vector.extract_strided_slice %12 {offsets = [0, 64], sizes = [16, 16], strides = [1, 1]} : vector<16x128xbf16> to vector<16x16xbf16>
    %89 = vector.extract_strided_slice %14 {offsets = [0, 64], sizes = [16, 16], strides = [1, 1]} : vector<16x128xbf16> to vector<16x16xbf16>
    %cst_28 = arith.constant dense<0.000000e+00> : vector<16x16xf32>
    %90 = tpu.matmul %87, %88, %cst_28 {dimension_numbers = #tpu.dot_dimension_numbers<[1], [1], [0], [0], [0, 0, 1, 0], [], []>} : vector<16x16xbf16>, vector<16x16xbf16>, vector<16x16xf32> -> vector<16x16xf32>
    %cst_29 = arith.constant dense<0xFF800000> : vector<16xf32>
    %91 = vector.multi_reduction <maximumf>, %90, %cst_29 [1] : vector<16x16xf32> to vector<16xf32>
    %92 = vector.shape_cast %91 : vector<16xf32> to vector<16x1xf32>
    %93 = vector.broadcast %92 : vector<16x1xf32> to vector<16x16xf32>
    %94 = arith.subf %90, %93 : vector<16x16xf32>
    %95 = math.exp %94 : vector<16x16xf32>
    %cst_30 = arith.constant dense<0.000000e+00> : vector<16xf32>
    %96 = vector.multi_reduction <add>, %95, %cst_30 [1] : vector<16x16xf32> to vector<16xf32>
    %97 = vector.shape_cast %96 : vector<16xf32> to vector<16x1xf32>
    %98 = tpu.reciprocal %97 {approx = true} : vector<16x1xf32> -> vector<16x1xf32>
    %99 = vector.broadcast %98 : vector<16x1xf32> to vector<16x16xf32>
    %100 = arith.mulf %95, %99 : vector<16x16xf32>
    %101 = arith.truncf %100 : vector<16x16xf32> to vector<16x16xbf16>
    %cst_31 = arith.constant dense<0.000000e+00> : vector<16x16xf32>
    %102 = tpu.matmul %101, %89, %cst_31 {dimension_numbers = #tpu.dot_dimension_numbers<[1], [0], [0], [1], [0, 0, 1, 1], [], []>} : vector<16x16xbf16>, vector<16x16xbf16>, vector<16x16xf32> -> vector<16x16xf32>
    %103 = arith.truncf %102 : vector<16x16xf32> to vector<16x16xbf16>
    %c0_32 = arith.constant 0 : index
    %c64 = arith.constant 64 : index
    %104 = vector.load %arg7[%c0_32, %c64] : memref<16x128xbf16, #tpu.memory_space<vmem>>, vector<16x16xbf16>
    tpu.vector_store %arg7[%c0_32, %c64], %103 {strides = array<i32>} : memref<16x128xbf16, #tpu.memory_space<vmem>>, vector<16x16xbf16>,
    %105 = vector.extract_strided_slice %10 {offsets = [0, 80], sizes = [16, 16], strides = [1, 1]} : vector<16x128xbf16> to vector<16x16xbf16>
    %106 = vector.extract_strided_slice %12 {offsets = [0, 80], sizes = [16, 16], strides = [1, 1]} : vector<16x128xbf16> to vector<16x16xbf16>
    %107 = vector.extract_strided_slice %14 {offsets = [0, 80], sizes = [16, 16], strides = [1, 1]} : vector<16x128xbf16> to vector<16x16xbf16>
    %cst_33 = arith.constant dense<0.000000e+00> : vector<16x16xf32>
    %108 = tpu.matmul %105, %106, %cst_33 {dimension_numbers = #tpu.dot_dimension_numbers<[1], [1], [0], [0], [0, 0, 1, 0], [], []>} : vector<16x16xbf16>, vector<16x16xbf16>, vector<16x16xf32> -> vector<16x16xf32>
    %cst_34 = arith.constant dense<0xFF800000> : vector<16xf32>
    %109 = vector.multi_reduction <maximumf>, %108, %cst_34 [1] : vector<16x16xf32> to vector<16xf32>
    %110 = vector.shape_cast %109 : vector<16xf32> to vector<16x1xf32>
    %111 = vector.broadcast %110 : vector<16x1xf32> to vector<16x16xf32>
    %112 = arith.subf %108, %111 : vector<16x16xf32>
    %113 = math.exp %112 : vector<16x16xf32>
    %cst_35 = arith.constant dense<0.000000e+00> : vector<16xf32>
    %114 = vector.multi_reduction <add>, %113, %cst_35 [1] : vector<16x16xf32> to vector<16xf32>
    %115 = vector.shape_cast %114 : vector<16xf32> to vector<16x1xf32>
    %116 = tpu.reciprocal %115 {approx = true} : vector<16x1xf32> -> vector<16x1xf32>
    %117 = vector.broadcast %116 : vector<16x1xf32> to vector<16x16xf32>
    %118 = arith.mulf %113, %117 : vector<16x16xf32>
    %119 = arith.truncf %118 : vector<16x16xf32> to vector<16x16xbf16>
    %cst_36 = arith.constant dense<0.000000e+00> : vector<16x16xf32>
    %120 = tpu.matmul %119, %107, %cst_36 {dimension_numbers = #tpu.dot_dimension_numbers<[1], [0], [0], [1], [0, 0, 1, 1], [], []>} : vector<16x16xbf16>, vector<16x16xbf16>, vector<16x16xf32> -> vector<16x16xf32>
    %121 = arith.truncf %120 : vector<16x16xf32> to vector<16x16xbf16>
    %c0_37 = arith.constant 0 : index
    %c80 = arith.constant 80 : index
    %122 = vector.load %arg7[%c0_37, %c80] : memref<16x128xbf16, #tpu.memory_space<vmem>>, vector<16x16xbf16>
    tpu.vector_store %arg7[%c0_37, %c80], %121 {strides = array<i32>} : memref<16x128xbf16, #tpu.memory_space<vmem>>, vector<16x16xbf16>,
    %123 = vector.extract_strided_slice %10 {offsets = [0, 96], sizes = [16, 16], strides = [1, 1]} : vector<16x128xbf16> to vector<16x16xbf16>
    %124 = vector.extract_strided_slice %12 {offsets = [0, 96], sizes = [16, 16], strides = [1, 1]} : vector<16x128xbf16> to vector<16x16xbf16>
    %125 = vector.extract_strided_slice %14 {offsets = [0, 96], sizes = [16, 16], strides = [1, 1]} : vector<16x128xbf16> to vector<16x16xbf16>
    %cst_38 = arith.constant dense<0.000000e+00> : vector<16x16xf32>
    %126 = tpu.matmul %123, %124, %cst_38 {dimension_numbers = #tpu.dot_dimension_numbers<[1], [1], [0], [0], [0, 0, 1, 0], [], []>} : vector<16x16xbf16>, vector<16x16xbf16>, vector<16x16xf32> -> vector<16x16xf32>
    %cst_39 = arith.constant dense<0xFF800000> : vector<16xf32>
    %127 = vector.multi_reduction <maximumf>, %126, %cst_39 [1] : vector<16x16xf32> to vector<16xf32>
    %128 = vector.shape_cast %127 : vector<16xf32> to vector<16x1xf32>
    %129 = vector.broadcast %128 : vector<16x1xf32> to vector<16x16xf32>
    %130 = arith.subf %126, %129 : vector<16x16xf32>
    %131 = math.exp %130 : vector<16x16xf32>
    %cst_40 = arith.constant dense<0.000000e+00> : vector<16xf32>
    %132 = vector.multi_reduction <add>, %131, %cst_40 [1] : vector<16x16xf32> to vector<16xf32>
    %133 = vector.shape_cast %132 : vector<16xf32> to vector<16x1xf32>
    %134 = tpu.reciprocal %133 {approx = true} : vector<16x1xf32> -> vector<16x1xf32>
    %135 = vector.broadcast %134 : vector<16x1xf32> to vector<16x16xf32>
    %136 = arith.mulf %131, %135 : vector<16x16xf32>
    %137 = arith.truncf %136 : vector<16x16xf32> to vector<16x16xbf16>
    %cst_41 = arith.constant dense<0.000000e+00> : vector<16x16xf32>
    %138 = tpu.matmul %137, %125, %cst_41 {dimension_numbers = #tpu.dot_dimension_numbers<[1], [0], [0], [1], [0, 0, 1, 1], [], []>} : vector<16x16xbf16>, vector<16x16xbf16>, vector<16x16xf32> -> vector<16x16xf32>
    %139 = arith.truncf %138 : vector<16x16xf32> to vector<16x16xbf16>
    %c0_42 = arith.constant 0 : index
    %c96 = arith.constant 96 : index
    %140 = vector.load %arg7[%c0_42, %c96] : memref<16x128xbf16, #tpu.memory_space<vmem>>, vector<16x16xbf16>
    tpu.vector_store %arg7[%c0_42, %c96], %139 {strides = array<i32>} : memref<16x128xbf16, #tpu.memory_space<vmem>>, vector<16x16xbf16>,
    %141 = vector.extract_strided_slice %10 {offsets = [0, 112], sizes = [16, 16], strides = [1, 1]} : vector<16x128xbf16> to vector<16x16xbf16>
    %142 = vector.extract_strided_slice %12 {offsets = [0, 112], sizes = [16, 16], strides = [1, 1]} : vector<16x128xbf16> to vector<16x16xbf16>
    %143 = vector.extract_strided_slice %14 {offsets = [0, 112], sizes = [16, 16], strides = [1, 1]} : vector<16x128xbf16> to vector<16x16xbf16>
    %cst_43 = arith.constant dense<0.000000e+00> : vector<16x16xf32>
    %144 = tpu.matmul %141, %142, %cst_43 {dimension_numbers = #tpu.dot_dimension_numbers<[1], [1], [0], [0], [0, 0, 1, 0], [], []>} : vector<16x16xbf16>, vector<16x16xbf16>, vector<16x16xf32> -> vector<16x16xf32>
    %cst_44 = arith.constant dense<0xFF800000> : vector<16xf32>
    %145 = vector.multi_reduction <maximumf>, %144, %cst_44 [1] : vector<16x16xf32> to vector<16xf32>
    %146 = vector.shape_cast %145 : vector<16xf32> to vector<16x1xf32>
    %147 = vector.broadcast %146 : vector<16x1xf32> to vector<16x16xf32>
    %148 = arith.subf %144, %147 : vector<16x16xf32>
    %149 = math.exp %148 : vector<16x16xf32>
    %cst_45 = arith.constant dense<0.000000e+00> : vector<16xf32>
    %150 = vector.multi_reduction <add>, %149, %cst_45 [1] : vector<16x16xf32> to vector<16xf32>
    %151 = vector.shape_cast %150 : vector<16xf32> to vector<16x1xf32>
    %152 = tpu.reciprocal %151 {approx = true} : vector<16x1xf32> -> vector<16x1xf32>
    %153 = vector.broadcast %152 : vector<16x1xf32> to vector<16x16xf32>
    %154 = arith.mulf %149, %153 : vector<16x16xf32>
    %155 = arith.truncf %154 : vector<16x16xf32> to vector<16x16xbf16>
    %cst_46 = arith.constant dense<0.000000e+00> : vector<16x16xf32>
    %156 = tpu.matmul %155, %143, %cst_46 {dimension_numbers = #tpu.dot_dimension_numbers<[1], [0], [0], [1], [0, 0, 1, 1], [], []>} : vector<16x16xbf16>, vector<16x16xbf16>, vector<16x16xf32> -> vector<16x16xf32>
    %157 = arith.truncf %156 : vector<16x16xf32> to vector<16x16xbf16>
    %c0_47 = arith.constant 0 : index
    %c112 = arith.constant 112 : index
    %158 = vector.load %arg7[%c0_47, %c112] : memref<16x128xbf16, #tpu.memory_space<vmem>>, vector<16x16xbf16>
    tpu.vector_store %arg7[%c0_47, %c112], %157 {strides = array<i32>} : memref<16x128xbf16, #tpu.memory_space<vmem>>, vector<16x16xbf16>,
    %c0_48 = arith.constant 0 : index
    %c0_49 = arith.constant 0 : index
    %159 = vector.load %arg7[%c0_48, %c0_49] : memref<16x128xbf16, #tpu.memory_space<vmem>>, vector<16x128xbf16>
    %c0_50 = arith.constant 0 : index
    %c0_51 = arith.constant 0 : index
    %160 = vector.load %arg4[%c0_50, %c0_51] : memref<128x128xbf16, #tpu.memory_space<vmem>>, vector<128x128xbf16>
    %cst_52 = arith.constant dense<0.000000e+00> : vector<16x128xf32>
    %161 = tpu.matmul %159, %160, %cst_52 {dimension_numbers = #tpu.dot_dimension_numbers<[1], [0], [0], [1], [0, 0, 1, 1], [], []>} : vector<16x128xbf16>, vector<128x128xbf16>, vector<16x128xf32> -> vector<16x128xf32>
    %c0_53 = arith.constant 0 : index
    %c0_54 = arith.constant 0 : index
    %162 = vector.load %arg5[%c0_53, %c0_54] : memref<1x128xf32, #tpu.memory_space<vmem>>, vector<1x128xf32>
    %163 = vector.broadcast %162 : vector<1x128xf32> to vector<16x128xf32>
    %164 = arith.addf %161, %163 : vector<16x128xf32>
    %c0_55 = arith.constant 0 : index
    %c0_56 = arith.constant 0 : index
    %c0_57 = arith.constant 0 : index
    %165 = vector.load %arg6[%c0_55, %c0_56, %c0_57] : memref<1x16x128xf32, #tpu.memory_space<vmem>>, vector<1x16x128xf32>
    %166 = vector.shape_cast %165 : vector<1x16x128xf32> to vector<16x128xf32>
    %167 = vector.shape_cast %164 : vector<16x128xf32> to vector<1x16x128xf32>
    tpu.vector_store %arg6[%c0_55, %c0_56, %c0_57], %167 {strides = array<i32>} : memref<1x16x128xf32, #tpu.memory_space<vmem>>, vector<1x16x128xf32>,
    return
  }
  func.func @transform_0(%arg0: i32) -> (i32, i32, i32) {
    %c0_i32 = arith.constant 0 : i32
    %c0_i32_0 = arith.constant 0 : i32
    %c0_i32_1 = arith.constant 0 : i32
    return %arg0, %c0_i32, %c0_i32_0 : i32, i32, i32
  }
  func.func @transform_1(%arg0: i32) -> (i32, i32) {
    %c0_i32 = arith.constant 0 : i32
    %c0_i32_0 = arith.constant 0 : i32
    %c0_i32_1 = arith.constant 0 : i32
    return %c0_i32, %c0_i32_0 : i32, i32
  }
  func.func @transform_2(%arg0: i32) -> (i32, i32) {
    %c0_i32 = arith.constant 0 : i32
    %c0_i32_0 = arith.constant 0 : i32
    %c0_i32_1 = arith.constant 0 : i32
    return %c0_i32, %c0_i32_0 : i32, i32
  }
  func.func @transform_3(%arg0: i32) -> (i32, i32) {
    %c0_i32 = arith.constant 0 : i32
    %c0_i32_0 = arith.constant 0 : i32
    %c0_i32_1 = arith.constant 0 : i32
    return %c0_i32, %c0_i32_0 : i32, i32
  }
  func.func @transform_4(%arg0: i32) -> (i32, i32) {
    %c0_i32 = arith.constant 0 : i32
    %c0_i32_0 = arith.constant 0 : i32
    %c0_i32_1 = arith.constant 0 : i32
    return %c0_i32, %c0_i32_0 : i32, i32
  }
  func.func @transform_5(%arg0: i32) -> (i32, i32, i32) {
    %c0_i32 = arith.constant 0 : i32
    %c0_i32_0 = arith.constant 0 : i32
    %c0_i32_1 = arith.constant 0 : i32
    return %arg0, %c0_i32, %c0_i32_0 : i32, i32, i32
  }
}

</mosaic_0001>

<bundles_post_ra>
// kernel: tpu_custom_call.1
= control target key start
LH: loop header
LB: loop body
LE: loop exit
PB: predicated region body
PF: predicated region fallthrough
CT: control target
= control target key end

     0   :  { %10 = vsyncpa [#allocation4], 0  ;;  %s2949_s0 = inlined_call_operand.hbm [shape: bf16[2,16,128], index: 0, kind: input, shape index: {}]   ;;  %s2950_s1 = inlined_call_operand.hbm [shape: bf16[128,384], index: 1, kind: input, shape index: {}]   ;;  %s2951_s2 = inlined_call_operand.vmem [shape: f32[1,384], index: 2, kind: input, shape index: {}]   ;;  %s2952_s3 = inlined_call_operand.hbm [shape: bf16[128,128], index: 3, kind: input, shape index: {}]   ;;  %s2953_s4 = inlined_call_operand.vmem [shape: f32[1,128], index: 4, kind: input, shape index: {}]   ;;  %s2954_s5 = inlined_call_operand.hbm [shape: f32[2,16,128], index: 5, kind: output, shape index: {}]  }
   0x1   :  { %12 = vsyncpa [#allocation4 + $0x1], 0 }
   0x2   :  { %13 = vsyncpa [#allocation7], 0 }
   0x3   :  { %14 = vsyncpa [#allocation5], 0 }
   0x4   :  { %16 = vsyncpa [#allocation5 + $0x1], 0  ;;  %s2436_s18 = smov 0   ;;  %s2438_s19 = smov 0  }
   0x5   :  { %s2440_s20 = smov 0   ;;  %s2442_s21 = smov 0  }
   0x6 LB: > { %s2457_s22 = sadd.s32 4294967295, %s2384_s21   ;;  %s1784_s23 = sadd.s32 4294967294, %s2384_s21   ;;  %s2384_s21 = sphi %s2442_s21, %s2974_s21   ;;  %s2380_s20 = sphi %s2440_s20, %s2973_s20   ;;  %s2376_s19 = sphi %s2438_s19, %s2972_s19   ;;  %s2372_s18 = sphi %s2436_s18, %s2971_s18  }
   0x7   : > { %p42_p0 = scmp.ne.s32.totalorder %s2376_s19, %s2372_s18  ;;  %p2955_p1 = scmp.eq.s32.totalorder %s2457_s22, 0 }
   0x8   : > { %p156_p3 = scmp.eq.s32.totalorder %s1784_s23, 1  ;;  %p1785_p5 = scmp.ge.s32.totalorder %s2384_s21, 1 }
   0x9   : > { %p2466_p4 = por %p2955_p1, %p42_p0  ;;  %p163_p7 = scmp.lt.s32.totalorder %s2384_s21, 3 }
   0xa   : > { %p2471_p6 = por %p156_p3, %p42_p0  ;;  %s2386_s27 = smov [#allocation6]  }
   0xb   : > { %s2958_s24 = scalar_select %p2466_p4, 1, 0 }
   0xc   : > { %s2959_s25 = scalar_select %p2471_p6, 1, 0 }
   0xd   : > { %p2476_p8 = pnand %p1785_p5, %p163_p7  ;;  %s175_s28 = sshll.u32 %s2386_s27, 4  ;;  %s2480_s28 = int_to_ptr.vmem [resolvable:$true] %s175_s28 }
   0xe   : > { %s2387_s30 = smov [#allocation8]   ;;  %s2228_s9 = scalar_lea.hbm %s2950_s1, 3072 }
   0xf   : > { %p2052_p9 = pneg %p2476_p8  ;;  %s191_s6 = sshll.u32 %s2387_s30, 4  ;;  %s2491_s6 = int_to_ptr.vmem [resolvable:$true] %s191_s6 }
  0x10   : > { %p2229_p12 = scmp.ne.s32.totalorder %s2950_s1, %s2228_s9  ;;  %p2235_p5 = scmp.lt.u32.totalorder %s2228_s9, %s2950_s1 }
  0x11   : > { %p2487_p11 = pnand %p2052_p9, %p2955_p1 }
  0x13   : > { %p2230_p13 = pneg %p2487_p11 }
  0x15   : > { %p2231_p0 = pnand %p2230_p13, %p2229_p12 }
  0x17   : > { %p2232_p3 = pneg %p2231_p0 }
  0x19   : > { %p2237_p7 = pnand %p2235_p5, %p2232_p3 }
  0x1b   : > { %2240 = shalt.err (!%p2237_p7)
}
  0x1c   : > { %s2241_s14 = scalar_lea.vmem %s2480_s28, 3072  ;;  %p2249_p2 = scmp.lt.s32.totalorder %s2480_s28, %s2480_s28 }
  0x1d   : > { %p2242_p9 = scmp.ne.s32.totalorder %s2480_s28, %s2241_s14  ;;  %p2250_p12 = scmp.lt.s32.totalorder %s2241_s14, %s2241_s14 }
  0x1f   : > { %p2244_p10 = pnand %p2242_p9, %p2230_p13  ;;  %p2251_p0 = por %p2250_p12, %p2249_p2 }
  0x21   : > { %p2245_p1 = pneg %p2244_p10 }
  0x23   : > { %p2252_p6 = pnand %p2251_p0, %p2245_p1 }
  0x25   : > { %2255 = shalt.err (!%p2252_p6)
}
  0x26   : > { %s2388_s15 = smov 192   ;;  %s2389_s16 = smov 12  }
  0x27   : > { %2055 = dma.hbm_to_vmem [thread:$0]  (!%p2487_p11), %s2950_s1, 3072, %s2480_s28, [#allocation7], %s2388_s15, %s2388_s15, %s2389_s16  }
  0x28   : > { %s2256_s7 = scalar_lea.hbm %s2952_s3, 1024 }
  0x29   : > { %p2257_p2 = scmp.ne.s32.totalorder %s2952_s3, %s2256_s7  ;;  %p2263_p10 = scmp.lt.u32.totalorder %s2256_s7, %s2952_s3 }
  0x2b   : > { %p2259_p1 = pnand %p2257_p2, %p2230_p13 }
  0x2d   : > { %p2260_p6 = pneg %p2259_p1 }
  0x2f   : > { %p2265_p3 = pnand %p2263_p10, %p2260_p6 }
  0x31   : > { %2268 = shalt.err (!%p2265_p3)
}
  0x32   : > { %s2269_s28 = scalar_lea.vmem %s2491_s6, 1024  ;;  %p2277_p12 = scmp.lt.s32.totalorder %s2491_s6, %s2491_s6 }
  0x33   : > { %p2270_p5 = scmp.ne.s32.totalorder %s2491_s6, %s2269_s28  ;;  %p2278_p0 = scmp.lt.s32.totalorder %s2269_s28, %s2269_s28 }
  0x35   : > { %p2272_p7 = pnand %p2270_p5, %p2230_p13  ;;  %p2279_p2 = por %p2278_p0, %p2277_p12 }
  0x37   : > { %p2273_p9 = pneg %p2272_p7 }
  0x39   : > { %p2280_p1 = pnand %p2279_p2, %p2273_p9 }
  0x3b   : > { %2283 = shalt.err (!%p2280_p1)
}
  0x3c   : > { %s2390_s12 = smov 64   ;;  %s2391_s13 = smov 4  }
  0x3d   : > { %2058 = dma.hbm_to_vmem [thread:$0]  (!%p2487_p11), %s2952_s3, 1024, %s2491_s6, [#allocation7], %s2390_s12, %s2390_s12, %s2391_s13  }
  0x3e   : > { %s2549_s16 = sadd.s32 1, %s2384_s21   ;;  %s29_s23 = sadd.s32 1, %s2380_s20 }
  0x3f   : > { %s26_s17 = ssub.s32 %s2384_s21, %s2549_s16  ;;  %p36_p6 = scmp.ne.s32.totalorder %s2380_s20, %s2376_s19 }
  0x40   : > { %p27_p13 = scmp.eq.s32.totalorder %s26_s17, 0  ;;  %p37_p10 = scmp.eq.s32.totalorder %s2384_s21, 0 }
  0x41   : > { %p2962_p5 = scmp.eq.s32.totalorder %s2457_s22, 1  ;;  %p2069_p9 = scmp.lt.s32.totalorder %s2384_s21, 2 }
  0x42   : > { %s2558_s27 = scalar_select %p27_p13, %s2380_s20, %s29_s23  }
  0x43   : > { %p38_p3 = por %p37_p10, %p36_p6  ;;  %p2562_p7 = por %p2962_p5, %p36_p6 }
  0x44   : > { %s208_s30 = sand.u32 1, %s2380_s20   ;;  %s1852_s6 = sshll.u32 %s2384_s21, 7 }
  0x45   : > { %s2963_s29 = scalar_select %p2562_p7, 1, 0 }
  0x46   : > { %s1789_s7 = sshll.u32 %s208_s30, 3  ;;  %s2572_s10 = scalar_lea.hbm %s2949_s0, %s1852_s6 }
  0x47   : > { %s212_s11 = scalar_lea.vmem [#allocation3], %s1789_s7  ;;  %p2576_p11 = pnand %p2069_p9, %p38_p3 }
  0x48   : > { %s219_s28 = sshll.u32 %s212_s11, 4  ;;  %s2580_s15 = scalar_lea.sflag [#allocation4], %s208_s30  ;;  %s2574_s28 = int_to_ptr.vmem [resolvable:$true] %s219_s28 }
  0x49   : > { %s2284_s17 = scalar_lea.hbm %s2572_s10, 128  ;;  %p2286_p0 = pneg %p2576_p11 }
  0x4a   : > { %p2285_p12 = scmp.ne.s32.totalorder %s2572_s10, %s2284_s17  ;;  %s2289_s6 = scalar_lea.hbm %s2949_s0, 256 }
  0x4b   : > { %p2290_p13 = scmp.lt.u32.totalorder %s2572_s10, %s2949_s0  ;;  %p2291_p6 = scmp.lt.u32.totalorder %s2289_s6, %s2284_s17 }
  0x4c   : > { %p2287_p2 = pnand %p2286_p0, %p2285_p12  ;;  %p2293_p3 = scmp.lt.u32.totalorder %s2284_s17, %s2572_s10 }
  0x4d   : > { %p2292_p10 = por %p2291_p6, %p2290_p13 }
  0x4e   : > { %p2288_p1 = pneg %p2287_p2 }
  0x4f   : > { %p2294_p5 = por %p2293_p3, %p2292_p10 }
  0x51   : > { %p2295_p9 = pnand %p2294_p5, %p2288_p1 }
  0x53   : > { %2298 = shalt.err (!%p2295_p9)
}
  0x54   : > { %s2299_s30 = scalar_lea.vmem %s2574_s28, 128  ;;  %s2392_s11 = smov [#allocation3]  }
  0x55   : > { %p2300_p12 = scmp.ne.s32.totalorder %s2574_s28, %s2299_s30  ;;  %s2304_s23 = sshll.u32 %s2392_s11, 4  ;;  %s2305_s23 = int_to_ptr.vmem [resolvable:$false] %s2304_s23 }
  0x56   : > { %s2306_s7 = scalar_lea.vmem %s2305_s23, 256  ;;  %p2307_p4 = scmp.lt.s32.totalorder %s2574_s28, %s2305_s23 }
  0x57   : > { %p2302_p2 = pnand %p2300_p12, %p2286_p0  ;;  %p2308_p13 = scmp.lt.s32.totalorder %s2306_s7, %s2299_s30 }
  0x59   : > { %p2303_p7 = pneg %p2302_p2  ;;  %p2309_p6 = por %p2308_p13, %p2307_p4 }
  0x5b   : > { %p2310_p10 = pnand %p2309_p6, %p2303_p7 }
  0x5d   : > { %2313 = shalt.err (!%p2310_p10)
}
  0x5e   : > { %2062 = dma.hbm_to_vmem [thread:$0]  (!%p2576_p11), %s2572_s10, 128, %s2574_s28, %s2580_s15, %s2390_s12, %s2390_s12, %s2391_s13  }
  0x5f   : > { %231 = sbr.rel (%p2476_p8) target bundleno = 2110 (0x83e), region = 40  ;;  %s2614_s17 = sand.u32 (!%p2476_p8), 1, %s2376_s19  }
  0x60   : > { %s1793_s6 = sshll.u32 (!%p2476_p8), %s2614_s17, 3  ;;  %s234_s8 = scalar_lea.sflag (!%p2476_p8), [#allocation4], %s2614_s17 }
  0x61   : > { %s2618_s9 = scalar_lea.vmem (!%p2476_p8), [#allocation3], %s1793_s6  ;;  %p2965_p4 = scmp.ne.s32.totalorder (!%p2476_p8), %s2958_s24, 0 }
  0x66   : > { %2359 = dma.done.wait (%p2965_p4), %s234_s8, 128  }
  0x67   : > { %2361 = vsyncadd (%p2965_p4), %s234_s8, 4294967168  ;;  %p2966_p7 = scmp.eq.s32.totalorder %s2457_s22, 0 }
  0x69   : > { %2363 = dma.done.wait (%p2966_p7), [#allocation7], 4096   ;;  %p2967_p8 = pmov %p2966_p7 }
  0x6a   : > { %v2393_v0 = vmov 0   ;;  %v2394_v1 = vmov 0.0   ;;  %v2123_v2 = vld [vmem:[#allocation6 + $0x4] ss:$12 sps:$4 sm:$0xff]   ;;  %v2125_v3 = vld [vmem:[#allocation6] ss:$12 sps:$4 sm:$0xff]   ;;  %v309_v27 = vlaneseq }
  0x6b   : > { %2365 = vsyncadd (%p2967_p8), [#allocation7], 4294963200  ;;  %490 = vmatprep.mubr.bf16.mxu0 %v2393_v0  ;;  %1904 = vmatprep.subr.bf16.mxu1 %v2394_v1  ;;  %v2126_v4 = vld [vmem:[#allocation6 + $0x1c] ss:$12 sps:$4 sm:$0xff]   ;;  %v2128_v5 = vld [vmem:[#allocation6 + $0x18] ss:$12 sps:$4 sm:$0xff]  }
  0x6c   : > { %458 = vmatprep.subr.bf16.mxu0 %v2123_v2  ;;  %v2129_v6 = vld [vmem:[#allocation6 + $0x34] ss:$12 sps:$4 sm:$0xff]   ;;  %v2131_v7 = vld [vmem:[#allocation6 + $0x30] ss:$12 sps:$4 sm:$0xff]   ;;  %v2132_v8 = vld [vmem:[#allocation6 + $0x4c] ss:$12 sps:$4 sm:$0xff]  }
  0x6d   : > { %459 = vmatpush1.bf16.msra.mxu0 %v2125_v3  ;;  %v2134_v9 = vld [vmem:[#allocation6 + $0x48] ss:$12 sps:$4 sm:$0xff]   ;;  %v2135_v10 = vld [vmem:[#allocation6 + $0x64] ss:$12 sps:$4 sm:$0xff]   ;;  %v2149_v12 = vld [vmem:[#allocation6 + $0x20] ss:$12 sps:$4 sm:$0xff]  }
  0x6e   : > { %460 = vmatprep.subr.bf16.mxu0 %v2126_v4  ;;  %v2148_v11 = vld [vmem:[#allocation6 + $0x8] ss:$12 sps:$4 sm:$0xff]   ;;  %v2137_v13 = vld [vmem:[#allocation6 + $0x60] ss:$12 sps:$4 sm:$0xff]   ;;  %v2140_v15 = vld [vmem:[#allocation6 + $0x78] ss:$12 sps:$4 sm:$0xff]  }
  0x6f   : > { %1905 = vmatpush3.bf16.msra.mxu1 %v2148_v11  ;;  %v2138_v14 = vld [vmem:[#allocation6 + $0x7c] ss:$12 sps:$4 sm:$0xff]   ;;  %v2141_v16 = vld [vmem:[#allocation6 + $0x94] ss:$12 sps:$4 sm:$0xff]   ;;  %v2150_v17 = vld [vmem:[#allocation6 + $0x38] ss:$12 sps:$4 sm:$0xff]  }
  0x70   : > { %1906 = vmatprep.subr.bf16.mxu1 %v2394_v1  ;;  %v2151_v18 = vld [vmem:[#allocation6 + $0x50] ss:$12 sps:$4 sm:$0xff]   ;;  %v2144_v20 = vld [vmem:[#allocation6 + $0xac] ss:$12 sps:$4 sm:$0xff]   ;;  %v2152_v21 = vld [vmem:[#allocation6 + $0x68] ss:$12 sps:$4 sm:$0xff]  }
  0x71   : > { %461 = vmatpush1.bf16.msra.mxu0 %v2128_v5  ;;  %v2143_v19 = vld [vmem:[#allocation6 + $0x90] ss:$12 sps:$4 sm:$0xff]   ;;  %v2146_v22 = vld [vmem:[#allocation6 + $0xa8] ss:$12 sps:$4 sm:$0xff]   ;;  %v2153_v24 = vld [vmem:[#allocation6 + $0x80] ss:$12 sps:$4 sm:$0xff]  }
  0x72   : > { %462 = vmatprep.subr.bf16.mxu0 %v2129_v6  ;;  %v2147_v23 = vld [vmem:[%s2618_s9] sm:$0xff]   ;;  %vm2395_vm0 = vmmov 0   ;;  %v310_v28 = vshrl.u32 %v309_v27, 7  ;;  %v307_v30 = vld [vmem:[%s2951_s2] sm:$0x7]  ;;  %vm547_vm1 = vcmask 130048  }
  0x73   : > { %1907 = vmatpush3.bf16.msra.mxu1 %v2149_v12  ;;  %v2154_v25 = vld [vmem:[#allocation6 + $0x98] ss:$12 sps:$4 sm:$0xff]   ;;  %v2155_v26 = vld [vmem:[#allocation6 + $0xb0] ss:$12 sps:$4 sm:$0xff]   ;;  %1920 = vmatprep.mubr.msk.bf16.mxu1 %vm2395_vm0, %v2394_v1  ;;  %s2396_s12 = smov 112   ;;  %s2397_s13 = smov 80  }
  0x74   : > { %1908 = vmatprep.subr.bf16.mxu1 %v2394_v1  ;;  %v311_v29 = vsub.s32 0, %v310_v28  ;;  %v315_v31 = vsub.s32 1, %v310_v28  ;;  %v319_v47 = vsub.s32 2, %v310_v28  ;;  %s2398_s10 = smov 64   ;;  %s2399_s28 = smov 48   ;;  %vm793_vm2 = vcmask 261248  }
  0x75   : > { %463 = vmatpush1.bf16.msra.mxu0 %v2131_v7  ;;  %s2400_s14 = smov 32   ;;  %s2401_s15 = smov 16   ;;  %vm921_vm3 = vcmask 392448   ;;  %vm1049_vm4 = vcmask 523648   ;;  %vm1177_vm5 = vcmask 654848   ;;  %vm1305_vm6 = vcmask 786048  }
  0x76   : > { %464 = vmatprep.subr.bf16.mxu0 %v2132_v8  ;;  %v312_v32 = vrot.slane %v307_v30, %v311_v29  ;;  %v316_v34 = vrot.slane %v307_v30, %v315_v31  ;;  %v320_v48 = vrot.slane %v307_v30, %v319_v47  ;;  %s2402_s30 = smov 96   ;;  %vm1433_vm7 = vcmask 917248   ;;  %s1796_s11 = sshll.u32 %s2614_s17, 4 }
  0x77   : > { %1909 = vmatpush3.bf16.msra.mxu1 %v2150_v17  ;;  %vm1561_vm8 = vcmask 1048448   ;;  %s271_s6 = scalar_lea.vmem [#allocation9], %s1796_s11  ;;  %s1853_s9 = sshll.u32 %s2457_s22, 8 }
  0x78   : > { %1910 = vmatprep.subr.bf16.mxu1 %v2394_v1  ;;  %s1692_s8 = sshll.u32 %s271_s6, 4  ;;  %p2968_p0 = scmp.ne.s32.totalorder %s2963_s29, 0  ;;  %s2900_s8 = int_to_ptr.vmem [resolvable:$true] %s1692_s8 }
  0x79   : > { %465 = vmatpush1.bf16.msra.mxu0 %v2134_v9  ;;  %s2314_s22 = scalar_lea.vmem %s2900_s8, 256 }
  0x7a   : > { %466 = vmatprep.subr.bf16.mxu0 %v2135_v10  ;;  %p2315_p11 = scmp.ne.s32.totalorder %s2900_s8, %s2314_s22 }
  0x7b   : > { %1911 = vmatpush3.bf16.msra.mxu1 %v2151_v18 }
  0x7c   : > { %1912 = vmatprep.subr.bf16.mxu1 %v2394_v1  ;;  %p2316_p1 = pnand %p2315_p11, %p2968_p0 }
  0x7d   : > { %467 = vmatpush1.bf16.msra.mxu0 %v2137_v13 }
  0x7e   : > { %468 = vmatprep.subr.bf16.mxu0 %v2138_v14  ;;  %p2317_p3 = pneg %p2316_p1 }
  0x7f   : > { %1913 = vmatpush3.bf16.msra.mxu1 %v2152_v21 }
  0x80   : > { %1914 = vmatprep.subr.bf16.mxu1 %v2394_v1 }
  0x81   : > { %469 = vmatpush1.bf16.msra.mxu0 %v2140_v15 }
  0x82   : > { %470 = vmatprep.subr.bf16.mxu0 %v2141_v16 }
  0x83   : > { %1915 = vmatpush3.bf16.msra.mxu1 %v2153_v24 }
  0x84   : > { %1916 = vmatprep.subr.bf16.mxu1 %v2394_v1 }
  0x85   : > { %471 = vmatpush1.bf16.msra.mxu0 %v2143_v19 }
  0x86   : > { %472 = vmatprep.subr.bf16.mxu0 %v2144_v20 }
  0x87   : > { %1917 = vmatpush3.bf16.msra.mxu1 %v2154_v25 }
  0x88   : > { %1918 = vmatprep.subr.bf16.mxu1 %v2394_v1 }
  0x89   : > { %473 = vmatpush1.bf16.msra.mxu0 %v2146_v22 }
  0x8a   : > { %1948 = vmatprep.subr.bf16.mxu0 %v2394_v1 }
  0x8b   : > { %1919 = vmatpush3.bf16.msra.mxu1 %v2155_v26 }
  0x8c   : > { %491 = vmatmul.mubr.bf16.vlgmr.msra.gmra.mrb[0].mxu0 %v2147_v23  ;;  %1924 = vmatprep.subr.bf16.mxu1 %v2394_v1 }
  0x8d   : > { %1950 = vmatprep.mubr.msk.bf16.mxu0 %vm2395_vm0, %v2394_v1 }
  0x8e   : > { %1921 = vmatmul.mubr.bf16.vlgmr.msra.gmra.mrb[0].mxu1 %v2147_v23 }
  0x8f   : > { %1926 = vmatprep.mubr.msk.bf16.mxu1 %vm2395_vm0, %v2394_v1 }
 0x15f   : > { %v492_v33 = vpop.f32.mrb[0].mxu0 }
 0x160   : > { %v493_v35 = vadd.f32 %v492_v33, %v312_v32  ;;  %v494_v36 = vpop.f32.mrb[1].mxu0 }
 0x161   : > { %v496_v37 = vpop.f32.mrb[2].mxu0  ;;  %v495_v40 = vadd.f32 %v494_v36, %v316_v34  ;;  %v535_v49 = vpop.f32.mrb[0].mxu1 }
 0x162   : > { %v497_v38 = vadd.f32 %v496_v37, %v312_v32  ;;  %v498_v39 = vpop.f32.mrb[3].mxu0  ;;  %v542_v42 = vmul.f32 0.088388346, %v493_v35  ;;  %v536_v50 = vadd.f32 %v535_v49, %v320_v48  ;;  %v1922_v51 = vpop.f32.mrb[1].mxu1 }
 0x163   : > { %v499_v41 = vadd.f32 %v498_v39, %v316_v34  ;;  %v538_v52 = vpop.f32.mrb[2].mxu1 }
 0x164   : > { %v543_v43 = vmul.f32 0.088388346, %v497_v38  ;;  %v539_v53 = vadd.f32 %v538_v52, %v320_v48  ;;  %v1923_v54 = vpop.f32.mrb[3].mxu1 }
 0x165   : > { %v545_v44 = vpack.c.bf16 %v499_v41, %v495_v40 }
 0x166   : > { %v544_v45 = vpack.c.bf16 %v543_v43, %v542_v42  ;;  %v2653_v55 = vpack.c.bf16 %v539_v53, %v536_v50 }
 0x167   : > { %v552_v46 = vsel %vm547_vm1, %v545_v44, 0 }
 0x168   : > { %1925 = vmatpush3.bf16.xpose.msra.mxu1 %v552_v46 }
 0x169   : > { %1930 = vmatprep.subr.bf16.mxu1 %v2394_v1 }
 0x16f   : > { %1927 = vmatmul.mubr.msk.bf16.vlgmr.msra.gmra.mrb[4].mxu1 %vm547_vm1, %v544_v45 }
 0x170   : > { %1932 = vmatprep.mubr.msk.bf16.mxu1 %vm2395_vm0, %v2394_v1  ;;  %1931 = vmatpush3.bf16.msra.mxu1 %v2653_v55 }
 0x171   : > { %1936 = vmatprep.subr.bf16.mxu1 %v2394_v1 }
 0x242   : > { %v588_v56 = vpop.f32.mrb[4].mxu1 }
 0x243   : > { %v1928_v57 = vpop.f32.mrb[5].mxu1  ;;  %v595_v58 = vsel %vm547_vm1, %v588_v56, -inf }
 0x244   : > { %596 = vmax.xlane.f32.xlu0 %v595_v58  ;;  %v591_v59 = vpop.f32.mrb[6].mxu1 }
 0x245   : > { %v1929_v60 = vpop.f32.mrb[7].mxu1  ;;  %v598_v61 = vsel %vm547_vm1, %v591_v59, -inf }
 0x248   : > { %599 = vmax.xlane.f32.xlu0 %v598_v61 }
 0x25e   : > { %668 = vrot.lane.b32.xlu0 %v545_v44, %s2396_s12 }
 0x262   : > { %925 = vrot.lane.b32.xlu0 %v545_v44, %s2397_s13 }
 0x266   : > { %1053 = vrot.lane.b32.xlu0 %v545_v44, %s2398_s10 }
 0x26a   : > { %1181 = vrot.lane.b32.xlu0 %v545_v44, %s2399_s28 }
 0x26e   : > { %1309 = vrot.lane.b32.xlu0 %v545_v44, %s2400_s14 }
 0x272   : > { %1437 = vrot.lane.b32.xlu0 %v545_v44, %s2401_s15 }
 0x2d1   : > { %v597_v62 = vpop.xlane.xlu0 %596 }
 0x2d2   : > { %v601_v63 = vsub.f32 %v588_v56, %v597_v62 }
 0x2d4   : > { %v603_v0 = vmul.f32 1.442695, %v601_v63 }
 0x2d5   : > { %v600_v2 = vpop.xlane.xlu0 %599 }
 0x2d6   : > { %2164 = vpow2.f32 %v603_v0  ;;  %v602_v3 = vsub.f32 %v591_v59, %v600_v2 }
 0x2d8   : > { %v605_v4 = vmul.f32 1.442695, %v602_v3 }
 0x2d9   : > { %v669_v12 = vpop.permute.xlu0 %668 }
 0x2da   : > { %2166 = vpow2.f32 %v605_v4  ;;  %v674_v21 = vsel %vm547_vm1, %v669_v12, 0 }
 0x2dd   : > { %v926_v19 = vpop.permute.xlu0 %925 }
 0x2de   : > { %v931_v23 = vsel %vm547_vm1, %v926_v19, 0 }
 0x2e0   : > { %v2165_v5 = vpop.eup %2164 }
 0x2e1   : > { %v607_v6 = vsel %vm547_vm1, %v2165_v5, 0.0  ;;  %v1054_v24 = vpop.permute.xlu0 %1053 }
 0x2e2   : > { %608 = vadd.xlane.f32.xlu1 %v607_v6  ;;  %v1059_v26 = vsel %vm547_vm1, %v1054_v24, 0 }
 0x2e4   : > { %v2167_v7 = vpop.eup %2166 }
 0x2e5   : > { %v610_v8 = vsel %vm547_vm1, %v2167_v7, 0.0  ;;  %v1182_v27 = vpop.permute.xlu0 %1181 }
 0x2e6   : > { %611 = vadd.xlane.f32.xlu1 %v610_v8  ;;  %v1187_v29 = vsel %vm547_vm1, %v1182_v27, 0 }
 0x2e9   : > { %v1310_v30 = vpop.permute.xlu0 %1309 }
 0x2ea   : > { %v1315_v32 = vsel %vm547_vm1, %v1310_v30, 0 }
 0x2ed   : > { %v1438_v33 = vpop.permute.xlu0 %1437 }
 0x2ee   : > { %v1443_v35 = vsel %vm547_vm1, %v1438_v33, 0 }
 0x2f7   : > { %665 = vrot.lane.b32.xlu1 %v544_v45, %s2396_s12 }
 0x2fb   : > { %797 = vrot.lane.b32.xlu1 %v545_v44, %s2402_s30 }
 0x2ff   : > { %795 = vrot.lane.b32.xlu1 %v544_v45, %s2402_s30 }
 0x303   : > { %923 = vrot.lane.b32.xlu1 %v544_v45, %s2397_s13 }
 0x307   : > { %1051 = vrot.lane.b32.xlu1 %v544_v45, %s2398_s10 }
 0x30b   : > { %1179 = vrot.lane.b32.xlu1 %v544_v45, %s2399_s28 }
 0x30f   : > { %1307 = vrot.lane.b32.xlu1 %v544_v45, %s2400_s14 }
 0x313   : > { %1435 = vrot.lane.b32.xlu1 %v544_v45, %s2401_s15 }
 0x36f   : > { %v609_v9 = vpop.xlane.xlu1 %608 }
 0x370   : > { %2168 = vrcp.f32 %v609_v9 }
 0x373   : > { %v612_v10 = vpop.xlane.xlu1 %611 }
 0x374   : > { %2170 = vrcp.f32 %v612_v10 }
 0x377   : > { %v666_v11 = vpop.permute.xlu1 %665 }
 0x37a   : > { %v2169_v14 = vpop.eup %2168 }
 0x37b   : > { %v798_v13 = vpop.permute.xlu1 %797  ;;  %v615_v17 = vmul.f32 %v2169_v14, %v2165_v5 }
 0x37c   : > { %v803_v15 = vsel %vm547_vm1, %v798_v13, 0 }
 0x37d   : > { %1949 = vmatpush3.bf16.xpose.msra.mxu0 %v803_v15 }
 0x37e   : > { %v2171_v16 = vpop.eup %2170  ;;  %1960 = vmatprep.subr.bf16.mxu0 %v2394_v1 }
 0x37f   : > { %v616_v18 = vmul.f32 %v2171_v16, %v2167_v7  ;;  %v796_v22 = vpop.permute.xlu1 %795 }
 0x381   : > { %v617_v20 = vpack.c.bf16 %v616_v18, %v615_v17 }
 0x383   : > { %1933 = vmatmul.mubr.msk.bf16.vlgmr.msra.gmra.mrb[8].mxu1 %vm547_vm1, %v617_v20  ;;  %v924_v25 = vpop.permute.xlu1 %923 }
 0x384   : > { %1937 = vmatpush3.bf16.xpose.msra.mxu1 %v674_v21  ;;  %1951 = vmatmul.mubr.msk.bf16.vlgmr.msra.gmra.mrb[4].mxu0 %vm547_vm1, %v796_v22 }
 0x385   : > { %1961 = vmatpush3.bf16.xpose.msra.mxu0 %v931_v23  ;;  %1938 = vmatprep.mubr.msk.bf16.mxu1 %vm2395_vm0, %v2394_v1 }
 0x386   : > { %1962 = vmatprep.mubr.msk.bf16.mxu0 %vm2395_vm0, %v2394_v1  ;;  %1972 = vmatprep.subr.bf16.mxu0 %v2394_v1 }
 0x387   : > { %1942 = vmatprep.subr.bf16.mxu1 %v2394_v1  ;;  %v1052_v28 = vpop.permute.xlu1 %1051 }
 0x38b   : > { %1939 = vmatmul.mubr.msk.bf16.vlgmr.msra.gmra.mrb[12].mxu1 %vm547_vm1, %v666_v11  ;;  %v1180_v31 = vpop.permute.xlu1 %1179 }
 0x38c   : > { %1963 = vmatmul.mubr.msk.bf16.vlgmr.msra.gmra.mrb[8].mxu0 %vm547_vm1, %v924_v25  ;;  %1944 = vmatprep.mubr.msk.bf16.mxu1 %vm2395_vm0, %v2394_v1 }
 0x38d   : > { %1973 = vmatpush3.bf16.xpose.msra.mxu0 %v1059_v26  ;;  %1974 = vmatprep.mubr.msk.bf16.mxu0 %vm2395_vm0, %v2394_v1 }
 0x38e   : > { %1984 = vmatprep.subr.bf16.mxu0 %v2394_v1 }
 0x38f   : > { %v1308_v34 = vpop.permute.xlu1 %1307 }
 0x393   : > { %v1436_v36 = vpop.permute.xlu1 %1435 }
 0x394   : > { %1975 = vmatmul.mubr.msk.bf16.vlgmr.msra.gmra.mrb[12].mxu0 %vm547_vm1, %v1052_v28 }
 0x395   : > { %1985 = vmatpush3.bf16.xpose.msra.mxu0 %v1187_v29  ;;  %1986 = vmatprep.mubr.msk.bf16.mxu0 %vm2395_vm0, %v2394_v1 }
 0x396   : > { %1996 = vmatprep.subr.bf16.mxu0 %v2394_v1 }
 0x39c   : > { %1987 = vmatmul.mubr.msk.bf16.vlgmr.msra.gmra.mrb[16].mxu0 %vm547_vm1, %v1180_v31 }
 0x39d   : > { %1997 = vmatpush3.bf16.xpose.msra.mxu0 %v1315_v32  ;;  %1998 = vmatprep.mubr.msk.bf16.mxu0 %vm2395_vm0, %v2394_v1 }
 0x39e   : > { %2008 = vmatprep.subr.bf16.mxu0 %v2394_v1 }
 0x3a4   : > { %1999 = vmatmul.mubr.msk.bf16.vlgmr.msra.gmra.mrb[20].mxu0 %vm547_vm1, %v1308_v34 }
 0x3a5   : > { %2009 = vmatpush3.bf16.xpose.msra.mxu0 %v1443_v35  ;;  %2010 = vmatprep.mubr.msk.bf16.mxu0 %vm2395_vm0, %v2394_v1 }
 0x3a6   : > { %2020 = vmatprep.subr.bf16.mxu0 %v2394_v1 }
 0x3ac   : > { %2011 = vmatmul.mubr.msk.bf16.vlgmr.msra.gmra.mrb[24].mxu0 %vm547_vm1, %v1436_v36 }
 0x3ad   : > { %2036 = vmatprep.mubr.msk.bf16.mxu0 %vm2395_vm0, %v2394_v1 }
 0x456   : > { %v655_v37 = vpop.f32.mrb[8].mxu1 }
 0x457   : > { %v1934_v38 = vpop.f32.mrb[9].mxu1  ;;  %v2713_v39 = vpop.f32.mrb[4].mxu0 }
 0x458   : > { %v658_v40 = vpop.f32.mrb[10].mxu1  ;;  %v1952_v41 = vpop.f32.mrb[5].mxu0  ;;  %v846_v57 = vsel %vm547_vm1, %v2713_v39, -inf }
 0x459   : > { %v662_v42 = vpack.c.bf16 %v658_v40, %v655_v37  ;;  %v1935_v43 = vpop.f32.mrb[11].mxu1  ;;  %v2715_v44 = vpop.f32.mrb[6].mxu0 }
 0x45a   : > { %v1953_v45 = vpop.f32.mrb[7].mxu0  ;;  %v849_v60 = vsel %vm547_vm1, %v2715_v44, -inf }
 0x45b   : > { %663 = vst.msk [vmem:[#allocation2] sm:$0xff] %vm547_vm1, %v662_v42 }
 0x45e   : > { %v2718_v46 = vpop.f32.mrb[12].mxu1 }
 0x45f   : > { %v1940_v47 = vpop.f32.mrb[13].mxu1  ;;  %v2720_v48 = vpop.f32.mrb[8].mxu0  ;;  %v717_v49 = vsel %vm547_vm1, %v2718_v46, -inf }
 0x460   : > { %v1964_v50 = vpop.f32.mrb[9].mxu0  ;;  %718 = vmax.xlane.f32.xlu0 %v717_v49  ;;  %v2724_v51 = vpop.f32.mrb[14].mxu1  ;;  %v974_v2 = vsel %vm547_vm1, %v2720_v48, -inf }
 0x461   : > { %v1941_v52 = vpop.f32.mrb[15].mxu1  ;;  %v970_v53 = vpop.f32.mrb[10].mxu0  ;;  %v720_v54 = vsel %vm547_vm1, %v2724_v51, -inf }
 0x462   : > { %v1965_v56 = vpop.f32.mrb[11].mxu0  ;;  %721 = vmax.xlane.f32.xlu1 %v720_v54  ;;  %v977_v58 = vsel %vm547_vm1, %v970_v53, -inf }
 0x464   : > { %847 = vmax.xlane.f32.xlu0 %v846_v57 }
 0x466   : > { %978 = vmax.xlane.f32.xlu1 %v977_v58 }
 0x467   : > { %v2731_v59 = vpop.f32.mrb[12].mxu0 }
 0x468   : > { %v1976_v61 = vpop.f32.mrb[13].mxu0  ;;  %850 = vmax.xlane.f32.xlu0 %v849_v60  ;;  %v1102_v4 = vsel %vm547_vm1, %v2731_v59, -inf }
 0x469   : > { %v1098_v62 = vpop.f32.mrb[14].mxu0 }
 0x46a   : > { %v1977_v63 = vpop.f32.mrb[15].mxu0  ;;  %v1105_v0 = vsel %vm547_vm1, %v1098_v62, -inf }
 0x46b   : > { %1106 = vmax.xlane.f32.xlu1 %v1105_v0 }
 0x46c   : > { %975 = vmax.xlane.f32.xlu0 %v974_v2 }
 0x46f   : > { %v2738_v3 = vpop.f32.mrb[16].mxu0 }
 0x470   : > { %v1988_v5 = vpop.f32.mrb[17].mxu0  ;;  %1103 = vmax.xlane.f32.xlu0 %v1102_v4  ;;  %v1230_v9 = vsel %vm547_vm1, %v2738_v3, -inf }
 0x471   : > { %v1226_v6 = vpop.f32.mrb[18].mxu0 }
 0x472   : > { %v1989_v7 = vpop.f32.mrb[19].mxu0  ;;  %v1233_v8 = vsel %vm547_vm1, %v1226_v6, -inf }
 0x473   : > { %1234 = vmax.xlane.f32.xlu1 %v1233_v8 }
 0x474   : > { %1231 = vmax.xlane.f32.xlu0 %v1230_v9 }
 0x477   : > { %v2745_v10 = vpop.f32.mrb[20].mxu0 }
 0x478   : > { %v2000_v11 = vpop.f32.mrb[21].mxu0  ;;  %v1358_v12 = vsel %vm547_vm1, %v2745_v10, -inf }
 0x479   : > { %v2749_v13 = vpop.f32.mrb[22].mxu0  ;;  %1359 = vmax.xlane.f32.xlu0 %v1358_v12 }
 0x47a   : > { %v2001_v14 = vpop.f32.mrb[23].mxu0  ;;  %v1361_v15 = vsel %vm547_vm1, %v2749_v13, -inf }
 0x47b   : > { %1362 = vmax.xlane.f32.xlu1 %v1361_v15 }
 0x47f   : > { %v2753_v16 = vpop.f32.mrb[24].mxu0 }
 0x480   : > { %v2012_v17 = vpop.f32.mrb[25].mxu0  ;;  %v1486_v18 = vsel %vm547_vm1, %v2753_v16, -inf }
 0x481   : > { %v2757_v19 = vpop.f32.mrb[26].mxu0  ;;  %1487 = vmax.xlane.f32.xlu0 %v1486_v18 }
 0x482   : > { %v2013_v20 = vpop.f32.mrb[27].mxu0  ;;  %v1489_v21 = vsel %vm547_vm1, %v2757_v19, -inf }
 0x483   : > { %1490 = vmax.xlane.f32.xlu1 %v1489_v21 }
 0x4ed   : > { %v719_v22 = vpop.xlane.xlu0 %718 }
 0x4ee   : > { %v723_v37 = vsub.f32 %v2718_v46, %v719_v22 }
 0x4ef   : > { %v722_v23 = vpop.xlane.xlu1 %721 }
 0x4f0   : > { %v725_v43 = vmul.f32 1.442695, %v723_v37  ;;  %v724_v52 = vsub.f32 %v2724_v51, %v722_v23 }
 0x4f1   : > { %v848_v24 = vpop.xlane.xlu0 %847 }
 0x4f2   : > { %v852_v25 = vsub.f32 %v2713_v39, %v848_v24 }
 0x4f3   : > { %v979_v26 = vpop.xlane.xlu1 %978 }
 0x4f4   : > { %v854_v27 = vmul.f32 1.442695, %v852_v25  ;;  %v981_v28 = vsub.f32 %v970_v53, %v979_v26 }
 0x4f5   : > { %v851_v29 = vpop.xlane.xlu0 %850 }
 0x4f6   : > { %2172 = vpow2.f32 %v854_v27  ;;  %v853_v30 = vsub.f32 %v2715_v44, %v851_v29  ;;  %v984_v31 = vmul.f32 1.442695, %v981_v28 }
 0x4f8   : > { %v856_v32 = vmul.f32 1.442695, %v853_v30  ;;  %v1107_v33 = vpop.xlane.xlu1 %1106 }
 0x4f9   : > { %v1109_v34 = vsub.f32 %v1098_v62, %v1107_v33  ;;  %v976_v35 = vpop.xlane.xlu0 %975 }
 0x4fa   : > { %2174 = vpow2.f32 %v856_v32  ;;  %v980_v36 = vsub.f32 %v2720_v48, %v976_v35 }
 0x4fb   : > { %2176 = vpow2.f32 %v984_v31  ;;  %v1112_v38 = vmul.f32 1.442695, %v1109_v34 }
 0x4fc   : > { %v982_v39 = vmul.f32 1.442695, %v980_v36 }
 0x4fd   : > { %v1104_v40 = vpop.xlane.xlu0 %1103 }
 0x4fe   : > { %2178 = vpow2.f32 %v982_v39  ;;  %v1108_v41 = vsub.f32 %v2731_v59, %v1104_v40  ;;  %v727_v59 = vmul.f32 1.442695, %v724_v52 }
 0x4ff   : > { %2180 = vpow2.f32 %v1112_v38 }
 0x500   : > { %v2766_v42 = vpop.eup %2172  ;;  %v1110_v44 = vmul.f32 1.442695, %v1108_v41  ;;  %v1235_v45 = vpop.xlane.xlu1 %1234 }
 0x501   : > { %v1237_v47 = vsub.f32 %v1226_v6, %v1235_v45  ;;  %v1232_v49 = vpop.xlane.xlu0 %1231  ;;  %v858_v48 = vsel %vm547_vm1, %v2766_v42, 0.0 }
 0x502   : > { %2182 = vpow2.f32 %v1110_v44  ;;  %v1236_v46 = vsub.f32 %v2738_v3, %v1232_v49  ;;  %859 = vadd.xlane.f32.xlu0 %v858_v48 }
 0x503   : > { %2184 = vpow2.f32 %v725_v43  ;;  %v1240_v53 = vmul.f32 1.442695, %v1237_v47 }
 0x504   : > { %v2771_v50 = vpop.eup %2174  ;;  %v1238_v54 = vmul.f32 1.442695, %v1236_v46 }
 0x505   : > { %v861_v56 = vsel %vm547_vm1, %v2771_v50, 0.0  ;;  %v2776_v57 = vpop.eup %2176 }
 0x506   : > { %2186 = vpow2.f32 %v1238_v54  ;;  %862 = vadd.xlane.f32.xlu1 %v861_v56  ;;  %v989_v61 = vsel %vm547_vm1, %v2776_v57, 0.0  ;;  %v1360_v11 = vpop.xlane.xlu0 %1359 }
 0x507   : > { %2188 = vpow2.f32 %v1240_v53  ;;  %v1364_v12 = vsub.f32 %v2745_v10, %v1360_v11 }
 0x508   : > { %v2778_v58 = vpop.eup %2178  ;;  %2190 = vpow2.f32 %v727_v59  ;;  %v1363_v15 = vpop.xlane.xlu1 %1362 }
 0x509   : > { %v986_v60 = vsel %vm547_vm1, %v2778_v58, 0.0  ;;  %v2784_v51 = vpop.eup %2180  ;;  %v1366_v14 = vmul.f32 1.442695, %v1364_v12  ;;  %v1365_v17 = vsub.f32 %v2749_v13, %v1363_v15 }
 0x50a   : > { %987 = vadd.xlane.f32.xlu0 %v986_v60  ;;  %990 = vadd.xlane.f32.xlu1 %v989_v61  ;;  %v1117_v0 = vsel %vm547_vm1, %v2784_v51, 0.0 }
 0x50b   : > { %2192 = vpow2.f32 %v1366_v14  ;;  %v1368_v20 = vmul.f32 1.442695, %v1365_v17 }
 0x50c   : > { %v2786_v62 = vpop.eup %2182 }
 0x50d   : > { %v1114_v63 = vsel %vm547_vm1, %v2786_v62, 0.0  ;;  %v2792_v2 = vpop.eup %2184  ;;  %2194 = vpow2.f32 %v1368_v20 }
 0x50e   : > { %1115 = vadd.xlane.f32.xlu0 %v1114_v63  ;;  %1118 = vadd.xlane.f32.xlu1 %v1117_v0  ;;  %v729_v4 = vsel %vm547_vm1, %v2792_v2, 0.0  ;;  %v1488_v18 = vpop.xlane.xlu0 %1487 }
 0x50f   : > { %v1492_v21 = vsub.f32 %v2753_v16, %v1488_v18 }
 0x510   : > { %v2794_v3 = vpop.eup %2186  ;;  %v1491_v22 = vpop.xlane.xlu1 %1490 }
 0x511   : > { %v1242_v5 = vsel %vm547_vm1, %v2794_v3, 0.0  ;;  %v2800_v6 = vpop.eup %2188  ;;  %v1494_v23 = vmul.f32 1.442695, %v1492_v21  ;;  %v1493_v24 = vsub.f32 %v2757_v19, %v1491_v22 }
 0x512   : > { %730 = vadd.xlane.f32.xlu0 %v729_v4  ;;  %1243 = vadd.xlane.f32.xlu1 %v1242_v5  ;;  %v1245_v7 = vsel %vm547_vm1, %v2800_v6, 0.0  ;;  %v2804_v8 = vpop.eup %2190 }
 0x513   : > { %v732_v9 = vsel %vm547_vm1, %v2804_v8, 0.0  ;;  %2196 = vpow2.f32 %v1494_v23  ;;  %v1496_v26 = vmul.f32 1.442695, %v1493_v24 }
 0x515   : > { %v2816_v25 = vpop.eup %2192  ;;  %2198 = vpow2.f32 %v1496_v26 }
 0x516   : > { %1246 = vadd.xlane.f32.xlu1 %v1245_v7  ;;  %v1370_v10 = vsel %vm547_vm1, %v2816_v25, 0.0 }
 0x517   : > { %v2820_v27 = vpop.eup %2194 }
 0x518   : > { %v1373_v13 = vsel %vm547_vm1, %v2820_v27, 0.0 }
 0x51a   : > { %733 = vadd.xlane.f32.xlu1 %v732_v9 }
 0x51d   : > { %v2824_v16 = vpop.eup %2196 }
 0x51e   : > { %v1498_v19 = vsel %vm547_vm1, %v2824_v16, 0.0 }
 0x51f   : > { %v2828_v28 = vpop.eup %2198 }
 0x520   : > { %v1501_v29 = vsel %vm547_vm1, %v2828_v28, 0.0 }
 0x528   : > { %741 = vrot.lane.b32.xlu0 %v2653_v55, %s2396_s12 }
 0x52b   : > { %869 = vrot.lane.b32.xlu1 %v2653_v55, %s2402_s30 }
 0x547   : > { %1371 = vadd.xlane.f32.xlu0 %v1370_v10 }
 0x54f   : > { %1374 = vadd.xlane.f32.xlu1 %v1373_v13 }
 0x553   : > { %1499 = vadd.xlane.f32.xlu1 %v1498_v19 }
 0x557   : > { %1502 = vadd.xlane.f32.xlu1 %v1501_v29 }
 0x55d   : > { %997 = vrot.lane.b32.xlu0 %v2653_v55, %s2397_s13 }
 0x561   : > { %1253 = vrot.lane.b32.xlu0 %v2653_v55, %s2399_s28 }
 0x565   : > { %1381 = vrot.lane.b32.xlu0 %v2653_v55, %s2400_s14 }
 0x568   : > { %1125 = vrot.lane.b32.xlu1 %v2653_v55, %s2398_s10 }
 0x569   : > { %1509 = vrot.lane.b32.xlu0 %v2653_v55, %s2401_s15 }
 0x58f   : > { %v860_v30 = vpop.xlane.xlu0 %859 }
 0x593   : > { %v863_v31 = vpop.xlane.xlu1 %862 }
 0x597   : > { %v988_v32 = vpop.xlane.xlu0 %987  ;;  %v991_v33 = vpop.xlane.xlu1 %990 }
 0x59b   : > { %v1116_v34 = vpop.xlane.xlu0 %1115  ;;  %v1119_v35 = vpop.xlane.xlu1 %1118 }
 0x59c   : > { %2200 = vrcp.f32 %v1116_v34 }
 0x59d   : > { %2202 = vrcp.f32 %v1119_v35 }
 0x59f   : > { %v731_v36 = vpop.xlane.xlu0 %730  ;;  %v1244_v37 = vpop.xlane.xlu1 %1243 }
 0x5a0   : > { %2204 = vrcp.f32 %v1244_v37 }
 0x5a3   : > { %v742_v38 = vpop.permute.xlu0 %741  ;;  %v1247_v39 = vpop.xlane.xlu1 %1246 }
 0x5a4   : > { %2206 = vrcp.f32 %v1247_v39  ;;  %1943 = vmatpush3.bf16.msra.mxu1 %v742_v38  ;;  %v2156_v38 = vld [vmem:[#allocation8] sm:$0xff]   ;;  %v2157_v39 = vld [vmem:[#allocation8 + $0x8] sm:$0xff]  }
 0x5a5   : > { %1954 = vmatprep.subr.bf16.mxu1 %v2394_v1  ;;  %2208 = vrcp.f32 %v731_v36  ;;  %2021 = vmatpush3.bf16.msra.mxu0 %v2156_v38 }
 0x5a6   : > { %v2201_v40 = vpop.eup %2200  ;;  %2022 = vmatprep.subr.bf16.mxu0 %v2394_v1 }
 0x5a7   : > { %v2203_v55 = vpop.eup %2202  ;;  %v1122_v41 = vmul.f32 %v2201_v40, %v2786_v62  ;;  %v734_v43 = vpop.xlane.xlu1 %733 }
 0x5a8   : > { %v1123_v44 = vmul.f32 %v2203_v55, %v2784_v51  ;;  %2210 = vrcp.f32 %v734_v43  ;;  %v2158_v55 = vld [vmem:[#allocation8 + $0x10] sm:$0xff]  }
 0x5a9   : > { %2212 = vrcp.f32 %v863_v31  ;;  %2023 = vmatpush3.bf16.msra.mxu0 %v2157_v39 }
 0x5aa   : > { %v1124_v45 = vpack.c.bf16 %v1123_v44, %v1122_v41  ;;  %v2205_v47 = vpop.eup %2204  ;;  %2214 = vrcp.f32 %v860_v30  ;;  %2024 = vmatprep.subr.bf16.mxu0 %v2394_v1  ;;  %v2159_v44 = vld [vmem:[#allocation8 + $0x18] sm:$0xff]  }
 0x5ab   : > { %v1250_v48 = vmul.f32 %v2205_v47, %v2794_v3  ;;  %v870_v51 = vpop.permute.xlu1 %869  ;;  %2216 = vrcp.f32 %v988_v32 }
 0x5ac   : > { %2218 = vrcp.f32 %v991_v33 }
 0x5ad   : > { %2025 = vmatpush3.bf16.msra.mxu0 %v2158_v55 }
 0x5ae   : > { %v2207_v49 = vpop.eup %2206  ;;  %2026 = vmatprep.subr.bf16.mxu0 %v2394_v1 }
 0x5af   : > { %v1251_v46 = vmul.f32 %v2207_v49, %v2800_v6  ;;  %v2209_v52 = vpop.eup %2208 }
 0x5b0   : > { %v737_v56 = vmul.f32 %v2209_v52, %v2792_v2 }
 0x5b1   : > { %v1252_v53 = vpack.c.bf16 %v1251_v46, %v1250_v48  ;;  %2027 = vmatpush3.bf16.msra.mxu0 %v2159_v44  ;;  %v2160_v48 = vld [vmem:[#allocation8 + $0x20] sm:$0xff]  }
 0x5b2   : > { %v2211_v54 = vpop.eup %2210  ;;  %2028 = vmatprep.subr.bf16.mxu0 %v2394_v1 }
 0x5b3   : > { %v738_v59 = vmul.f32 %v2211_v54, %v2804_v8  ;;  %v2213_v61 = vpop.eup %2212 }
 0x5b4   : > { %v2215_v62 = vpop.eup %2214  ;;  %v867_v63 = vmul.f32 %v2213_v61, %v2771_v50 }
 0x5b5   : > { %v739_v60 = vpack.c.bf16 %v738_v59, %v737_v56  ;;  %v866_v0 = vmul.f32 %v2215_v62, %v2766_v42  ;;  %v2217_v2 = vpop.eup %2216  ;;  %2029 = vmatpush3.bf16.msra.mxu0 %v2160_v48  ;;  %v2163_v62 = vld [vmem:[#allocation8 + $0x38] sm:$0xff]  }
 0x5b6   : > { %v2219_v4 = vpop.eup %2218  ;;  %v994_v6 = vmul.f32 %v2217_v2, %v2778_v58  ;;  %2030 = vmatprep.subr.bf16.mxu0 %v2394_v1 }
 0x5b7   : > { %1945 = vmatmul.mubr.msk.bf16.vlgmr.msra.gmra.mrb[16].mxu1 %vm547_vm1, %v739_v60  ;;  %v868_v3 = vpack.c.bf16 %v867_v63, %v866_v0  ;;  %v995_v7 = vmul.f32 %v2219_v4, %v2776_v57  ;;  %v2162_v60 = vld [vmem:[#allocation8 + $0x30] sm:$0xff]  }
 0x5b8   : > { %1955 = vmatpush3.bf16.msra.mxu1 %v870_v51  ;;  %1956 = vmatprep.mubr.msk.bf16.mxu1 %vm2395_vm0, %v2394_v1 }
 0x5b9   : > { %1966 = vmatprep.subr.bf16.mxu1 %v2394_v1  ;;  %v996_v8 = vpack.c.bf16 %v995_v7, %v994_v6 }
 0x5bf   : > { %1957 = vmatmul.mubr.msk.bf16.vlgmr.msra.gmra.mrb[20].mxu1 %vm547_vm1, %v868_v3 }
 0x5c0   : > { %1968 = vmatprep.mubr.msk.bf16.mxu1 %vm2395_vm0, %v2394_v1 }
 0x5d4   : > { %v1372_v5 = vpop.xlane.xlu0 %1371 }
 0x5d8   : > { %v998_v50 = vpop.permute.xlu0 %997 }
 0x5d9   : > { %1967 = vmatpush3.bf16.msra.mxu1 %v998_v50 }
 0x5da   : > { %1978 = vmatprep.subr.bf16.mxu1 %v2394_v1 }
 0x5dc   : > { %1969 = vmatmul.mubr.msk.bf16.vlgmr.msra.gmra.mrb[24].mxu1 %vm547_vm1, %v996_v8  ;;  %v1375_v42 = vpop.xlane.xlu1 %1374  ;;  %v1254_v57 = vpop.permute.xlu0 %1253 }
 0x5dd   : > { %1980 = vmatprep.mubr.msk.bf16.mxu1 %vm2395_vm0, %v2394_v1  ;;  %2220 = vrcp.f32 %v1375_v42 }
 0x5de   : > { %2222 = vrcp.f32 %v1372_v5 }
 0x5e0   : > { %v1500_v9 = vpop.xlane.xlu1 %1499  ;;  %v1382_v14 = vpop.permute.xlu0 %1381 }
 0x5e4   : > { %v1503_v11 = vpop.xlane.xlu1 %1502  ;;  %v1510_v22 = vpop.permute.xlu0 %1509 }
 0x5e5   : > { %2224 = vrcp.f32 %v1503_v11 }
 0x5e6   : > { %2226 = vrcp.f32 %v1500_v9 }
 0x5e7   : > { %v2221_v58 = vpop.eup %2220 }
 0x5e8   : > { %v1126_v12 = vpop.permute.xlu1 %1125  ;;  %v2223_v15 = vpop.eup %2222  ;;  %v1379_v17 = vmul.f32 %v2221_v58, %v2820_v27 }
 0x5e9   : > { %1979 = vmatpush3.bf16.msra.mxu1 %v1126_v12  ;;  %v1378_v18 = vmul.f32 %v2223_v15, %v2816_v25 }
 0x5ea   : > { %1990 = vmatprep.subr.bf16.mxu1 %v2394_v1 }
 0x5eb   : > { %v1380_v20 = vpack.c.bf16 %v1379_v17, %v1378_v18 }
 0x5ec   : > { %1981 = vmatmul.mubr.msk.bf16.vlgmr.msra.gmra.mrb[28].mxu1 %vm547_vm1, %v1124_v45 }
 0x5ed   : > { %1991 = vmatpush3.bf16.msra.mxu1 %v1254_v57  ;;  %1992 = vmatprep.mubr.msk.bf16.mxu1 %vm2395_vm0, %v2394_v1  ;;  %v1838_v57 = vld [vmem:[%s2953_s4] ss:$0 sm:$0xff] }
 0x5ee   : > { %2002 = vmatprep.subr.bf16.mxu1 %v2394_v1 }
 0x5ef   : > { %v2225_v21 = vpop.eup %2224 }
 0x5f0   : > { %v2227_v23 = vpop.eup %2226  ;;  %v1507_v24 = vmul.f32 %v2225_v21, %v2828_v28 }
 0x5f1   : > { %v1506_v26 = vmul.f32 %v2227_v23, %v2824_v16 }
 0x5f3   : > { %v1508_v10 = vpack.c.bf16 %v1507_v24, %v1506_v26 }
 0x5f4   : > { %1993 = vmatmul.mubr.msk.bf16.vlgmr.msra.gmra.mrb[32].mxu1 %vm547_vm1, %v1252_v53  ;;  %v2161_v53 = vld [vmem:[#allocation8 + $0x28] sm:$0xff]  }
 0x5f5   : > { %2003 = vmatpush3.bf16.msra.mxu1 %v1382_v14  ;;  %2004 = vmatprep.mubr.msk.bf16.mxu1 %vm2395_vm0, %v2394_v1 }
 0x5f6   : > { %2014 = vmatprep.subr.bf16.mxu1 %v2394_v1  ;;  %2031 = vmatpush3.bf16.msra.mxu0 %v2161_v53 }
 0x5f7   : > { %2032 = vmatprep.subr.bf16.mxu0 %v2394_v1 }
 0x5fa   : > { %2033 = vmatpush3.bf16.msra.mxu0 %v2162_v60 }
 0x5fb   : > { %2034 = vmatprep.subr.bf16.mxu0 %v2394_v1 }
 0x5fc   : > { %2005 = vmatmul.mubr.msk.bf16.vlgmr.msra.gmra.mrb[36].mxu1 %vm547_vm1, %v1380_v20 }
 0x5fd   : > { %2015 = vmatpush3.bf16.msra.mxu1 %v1510_v22  ;;  %2016 = vmatprep.mubr.msk.bf16.mxu1 %vm2395_vm0, %v2394_v1 }
 0x5fe   : > { %2035 = vmatpush3.bf16.msra.mxu0 %v2163_v62 }
 0x604   : > { %2017 = vmatmul.mubr.msk.bf16.vlgmr.msra.gmra.mrb[40].mxu1 %vm547_vm1, %v1508_v10 }
 0x68a   : > { %v781_v27 = vpop.f32.mrb[16].mxu1 }
 0x68b   : > { %v1946_v13 = vpop.f32.mrb[17].mxu1 }
 0x68c   : > { %v784_v25 = vpop.f32.mrb[18].mxu1 }
 0x68d   : > { %v788_v19 = vpack.c.bf16 %v784_v25, %v781_v27  ;;  %v1947_v29 = vpop.f32.mrb[19].mxu1 }
 0x68f   : > { %790 = vrot.lane.b32.xlu1 %v788_v19, %s2401_s15 }
 0x692   : > { %v909_v30 = vpop.f32.mrb[20].mxu1 }
 0x693   : > { %v1958_v31 = vpop.f32.mrb[21].mxu1 }
 0x694   : > { %v912_v32 = vpop.f32.mrb[22].mxu1 }
 0x695   : > { %v916_v33 = vpack.c.bf16 %v912_v32, %v909_v30  ;;  %v1959_v34 = vpop.f32.mrb[23].mxu1 }
 0x697   : > { %918 = vrot.lane.b32.xlu0 %v916_v33, %s2400_s14 }
 0x6af   : > { %v1037_v28 = vpop.f32.mrb[24].mxu1 }
 0x6b0   : > { %v1970_v35 = vpop.f32.mrb[25].mxu1 }
 0x6b1   : > { %v1040_v16 = vpop.f32.mrb[26].mxu1 }
 0x6b2   : > { %v1044_v36 = vpack.c.bf16 %v1040_v16, %v1037_v28  ;;  %v1971_v37 = vpop.f32.mrb[27].mxu1 }
 0x6b4   : > { %1046 = vrot.lane.b32.xlu1 %v1044_v36, %s2399_s28 }
 0x6bf   : > { %v1165_v40 = vpop.f32.mrb[28].mxu1 }
 0x6c0   : > { %v1982_v41 = vpop.f32.mrb[29].mxu1 }
 0x6c1   : > { %v1168_v43 = vpop.f32.mrb[30].mxu1 }
 0x6c2   : > { %v1172_v45 = vpack.c.bf16 %v1168_v43, %v1165_v40  ;;  %v1983_v47 = vpop.f32.mrb[31].mxu1 }
 0x6c4   : > { %1174 = vrot.lane.b32.xlu0 %v1172_v45, %s2398_s10  ;;  %s2403_s10 = smov [#allocation9]  }
 0x6c5   : > { %s2318_s28 = sshll.u32 %s2403_s10, 4  ;;  %s2319_s28 = int_to_ptr.vmem [resolvable:$false] %s2318_s28 }
 0x6c6   : > { %s2320_s14 = scalar_lea.vmem %s2319_s28, 512  ;;  %p2321_p5 = scmp.lt.s32.totalorder %s2900_s8, %s2319_s28 }
 0x6c7   : > { %v1293_v49 = vpop.f32.mrb[32].mxu1  ;;  %p2322_p9 = scmp.lt.s32.totalorder %s2320_s14, %s2314_s22 }
 0x6c8   : > { %v1994_v46 = vpop.f32.mrb[33].mxu1 }
 0x6c9   : > { %v1296_v52 = vpop.f32.mrb[34].mxu1  ;;  %p2323_p12 = por %p2322_p9, %p2321_p5 }
 0x6ca   : > { %v1300_v54 = vpack.c.bf16 %v1296_v52, %v1293_v49  ;;  %v1995_v56 = vpop.f32.mrb[35].mxu1 }
 0x6cb   : > { %p2324_p2 = pnand %p2323_p12, %p2317_p3 }
 0x6cc   : > { %1302 = vrot.lane.b32.xlu1 %v1300_v54, %s2397_s13  ;;  %s1679_s13 = scalar_lea.sflag [#allocation5], %s2614_s17 }
 0x6cf   : > { %v1421_v59 = vpop.f32.mrb[36].mxu1 }
 0x6d0   : > { %v2006_v61 = vpop.f32.mrb[37].mxu1 }
 0x6d1   : > { %v1424_v51 = vpop.f32.mrb[38].mxu1 }
 0x6d2   : > { %v1428_v63 = vpack.c.bf16 %v1424_v51, %v1421_v59  ;;  %v2007_v0 = vpop.f32.mrb[39].mxu1 }
 0x6d4   : > { %1430 = vrot.lane.b32.xlu0 %v1428_v63, %s2402_s30 }
 0x6d7   : > { %v1549_v3 = vpop.f32.mrb[40].mxu1 }
 0x6d8   : > { %v2018_v2 = vpop.f32.mrb[41].mxu1 }
 0x6d9   : > { %v1552_v4 = vpop.f32.mrb[42].mxu1 }
 0x6da   : > { %v1556_v5 = vpack.c.bf16 %v1552_v4, %v1549_v3  ;;  %v2019_v6 = vpop.f32.mrb[43].mxu1 }
 0x6dc   : > { %1558 = vrot.lane.b32.xlu1 %v1556_v5, %s2396_s12  ;;  %s2905_s12 = scalar_lea.hbm %s2954_s5, %s1853_s9 }
 0x701   : > { %v791_v7 = vpop.permute.xlu1 %790 }
 0x702   : > { %794 = vst.msk [vmem:[#allocation2] sm:$0xff] %vm793_vm2, %v791_v7 }
 0x709   : > { %v919_v50 = vpop.permute.xlu0 %918 }
 0x70a   : > { %922 = vst.msk [vmem:[#allocation2] sm:$0xff] %vm921_vm3, %v919_v50 }
 0x726   : > { %v1047_v8 = vpop.permute.xlu1 %1046 }
 0x727   : > { %1050 = vst.msk [vmem:[#allocation2] sm:$0xff] %vm1049_vm4, %v1047_v8 }
 0x736   : > { %v1175_v1 = vpop.permute.xlu0 %1174 }
 0x737   : > { %1178 = vst.msk [vmem:[#allocation2] sm:$0xff] %vm1177_vm5, %v1175_v1 }
 0x73e   : > { %v1303_v42 = vpop.permute.xlu1 %1302 }
 0x73f   : > { %1306 = vst.msk [vmem:[#allocation2] sm:$0xff] %vm1305_vm6, %v1303_v42 }
 0x746   : > { %v1431_v9 = vpop.permute.xlu0 %1430 }
 0x747   : > { %1434 = vst.msk [vmem:[#allocation2] sm:$0xff] %vm1433_vm7, %v1431_v9 }
 0x74e   : > { %v1559_v11 = vpop.permute.xlu1 %1558 }
 0x74f   : > { %1562 = vst.msk [vmem:[#allocation2] sm:$0xff] %vm1561_vm8, %v1559_v11 }
 0x756   : > { %v1563_v12 = vld [vmem:[#allocation2] sm:$0xff] }
 0x757   : > { %2037 = vmatmul.mubr.bf16.vlgmr.msra.gmra.mrb[28].mxu0 %v1563_v12 }
 0x82a   : > { %v1669_v58 = vpop.f32.mrb[28].mxu0 }
 0x82b   : > { %v1670_v14 = vadd.f32 %v1838_v57, %v1669_v58  ;;  %v2038_v15 = vpop.f32.mrb[29].mxu0 }
 0x82c   : > { %v1672_v17 = vpop.f32.mrb[30].mxu0 }
 0x82d   : > { %1676 = vst [vmem:[%s271_s6] sm:$0xff] %v1670_v14  ;;  %v1673_v18 = vadd.f32 %v1838_v57, %v1672_v17  ;;  %v2039_v20 = vpop.f32.mrb[31].mxu0 }
 0x82f   : > { %1677 = vst [vmem:[%s271_s6 + $0x8] sm:$0xff] %v1673_v18 }
 0x830   : > { %2327 = shalt.err (!%p2324_p2)
}
 0x831   : > { %s2328_s15 = scalar_lea.hbm %s2905_s12, 256  ;;  %s2332_s23 = scalar_lea.hbm %s2954_s5, 512 }
 0x832   : > { %p2329_p13 = scmp.ne.s32.totalorder %s2905_s12, %s2328_s15  ;;  %p2333_p4 = scmp.lt.u32.totalorder %s2905_s12, %s2954_s5 }
 0x833   : > { %p2334_p7 = scmp.lt.u32.totalorder %s2332_s23, %s2328_s15  ;;  %p2336_p11 = scmp.lt.u32.totalorder %s2328_s15, %s2905_s12 }
 0x834   : > { %p2330_p6 = pnand %p2329_p13, %p2968_p0 }
 0x835   : > { %p2335_p8 = por %p2334_p7, %p2333_p4 }
 0x836   : > { %p2331_p10 = pneg %p2330_p6 }
 0x837   : > { %p2337_p1 = por %p2336_p11, %p2335_p8 }
 0x839   : > { %p2338_p3 = pnand %p2337_p1, %p2331_p10 }
 0x83b   : > { %2341 = shalt.err (!%p2338_p3)
}
 0x83c   : > { %s2404_s9 = smov 128   ;;  %s2405_s24 = smov 8  }
 0x83d   : > { %2050 = dma.vmem_to_hbm [thread:$0]  (%p2968_p0), %s2900_s8, 256, %s2905_s12, %s1679_s13, %s2404_s9, %s2404_s9, %s2405_s24  }
 0x83e PF: > { %s1707_s26 = sand.u32 1, %s2372_s18   ;;  %p2969_p5 = scmp.ne.s32.totalorder %s2959_s25, 0 }
 0x83f   : > { %p2970_p9 = scmp.ge.s32.totalorder %s2384_s21, 2  ;;  %s1708_s22 = scalar_lea.sflag [#allocation5], %s1707_s26 }
 0x841   : > { %p2064_p12 = pnand %p2970_p9, %p2969_p5 }
 0x843   : > { %2367 = dma.done.wait (!%p2064_p12), %s1708_s22, 256  }
 0x844   : > { %2369 = vsyncadd (!%p2064_p12), %s1708_s22, 4294967040  ;;  %p19_p2 = scmp.ge.s32.totalorder %s2549_s16, 4   ;;  %s2971_s18 = smov %s2376_s19 }
 0x845   : > { %s2972_s19 = smov %s2380_s20  ;;  %s2973_s20 = smov %s2558_s27 }
 0x846   : > { %s2974_s21 = smov %s2549_s16  ;;  %21 = sbr.rel (!%p19_p2) target bundleno = 6 (0x6), region = 93 }
 0x84d   :  { %1713 = vsyncpa [#allocation4], 1 }
 0x84e   :  { %1715 = vsyncpa [#allocation4 + $0x1], 1 }
 0x84f   :  { %1716 = vsyncpa [#allocation7], 1 }
 0x850   :  { %1717 = vsyncpa [#allocation5], 1 }
 0x851   :  { %1719 = vsyncpa [#allocation5 + $0x1], 1 }

</bundles_post_ra>
